<compile_context>
chip_gen: v5e
topology: v5e:2x2
jax: 0.10.0
libtpu: 0.0.40
codegen_flags: <defaults>
</compile_context>

<pallas_src>
import numpy as np

import jax
import jax.numpy as jnp
from jax.experimental import pallas as pl
from jax.experimental.pallas import tpu as pltpu

H_0 = 90
H_1 = 90
H_2 = 90
H_3 = 90

F_PAD = 128          # lane-dense padded feature width
NUM_LAYERS = 3
_SUBLANE = 8
_LANE = 128


def _round_up(n, m):
    return (n + m - 1) // m * m


def _pad2(x, shape):
    return jnp.pad(x, [(0, s - d) for s, d in zip(shape, x.shape)])


_VMEM = pl.BlockSpec(memory_space=pltpu.MemorySpace.VMEM)


# ----------------------------------------------------------------------------
# Kernel 1: per graph-chunk, 3x SAGEConv(+ReLU) + partial mean-pool.
# ----------------------------------------------------------------------------
def _sage_chunk_kernel(a_ref, dinv_ref, x_ref, p_ref, w_ref, b_ref,
                       h3_ref, pooled_ref):
    """One graph-chunk stays resident in VMEM for all three layers.

    a_ref     : (TM, TM)       bf16  block-diagonal adjacency chunk (edge counts)
    dinv_ref  : (TM, 1)        f32   1/deg per node (mean normalization)
    x_ref     : (TM, 128)      bf16  zero-padded node features
    p_ref     : (Gp, TM)       bf16  binary graph-membership rows for this chunk
    w_ref     : (6, 128, 128)  bf16  [W_l, W_r] per layer, zero-padded
    b_ref     : (3, 1, 128)    f32   per-layer bias (zero-padded lanes)
    h3_ref    : (TM, 128)      bf16  final node embeddings for this chunk
    pooled_ref: (1, Gp, 128)   f32   per-chunk partial graph sums (pre 1/|g|)
    """
    a = a_ref[...]
    dinv = dinv_ref[...]
    h = x_ref[...]
    for layer in range(NUM_LAYERS):
        # Neighborhood sum on the MXU, mean normalization as a free f32 VPU scale.
        agg = jnp.dot(a, h, preferred_element_type=jnp.float32) * dinv
        # Two K=128 dots on static weight slices (no (TM, 256) concat buffer).
        z = (jnp.dot(agg.astype(jnp.bfloat16), w_ref[2 * layer],
                     preferred_element_type=jnp.float32)
             + jnp.dot(h, w_ref[2 * layer + 1],
                       preferred_element_type=jnp.float32)
             + b_ref[layer])
        # Padded lanes stay exactly zero because bias padding is zero (invariant).
        h = jnp.maximum(z, 0.0).astype(jnp.bfloat16)
    h3_ref[...] = h
    # Binary membership matmul: exact partial sums per graph (1/|g| applied later).
    pooled_ref[0] = jnp.dot(p_ref[...], h, preferred_element_type=jnp.float32)


# ----------------------------------------------------------------------------
# Kernel 2: sum per-chunk pooled partials, apply 1/|graph|, fc1/relu/fc2.
# ----------------------------------------------------------------------------
def _head_kernel(pp_ref, invc_ref, fc1w_ref, fc1b_ref, fc2w_ref, fc2b_ref,
                 out_ref):
    pooled = pp_ref[0]
    for c in range(1, pp_ref.shape[0]):     # each graph lives in exactly one chunk
        pooled = pooled + pp_ref[c]
    pooled = pooled * invc_ref[...]          # f32 global mean
    z1 = jnp.dot(pooled.astype(jnp.bfloat16), fc1w_ref[...],
                 preferred_element_type=jnp.float32) + fc1b_ref[...]
    z1 = jnp.maximum(z1, 0.0)
    out_ref[...] = jnp.dot(z1.astype(jnp.bfloat16), fc2w_ref[...],
                           preferred_element_type=jnp.float32) + fc2b_ref[...]


# ----------------------------------------------------------------------------
# Parameters (logical shapes, torch-equivalent init)
# ----------------------------------------------------------------------------
def kaiming_uniform(key, fan_in, fan_out):
    # torch kaiming_uniform_(nonlinearity='relu'): bound = sqrt(6 / fan_in)
    bound = (6.0 / fan_in) ** 0.5
    # stored as (fan_in, fan_out) so application is x @ W
    return jax.random.uniform(
        key, (fan_in, fan_out), dtype=jnp.float32, minval=-bound, maxval=bound
    )


def init_params(key):
    keys = jax.random.split(key, 8)
    dims = [(H_0, H_1), (H_1, H_2), (H_2, H_3)]
    params = {}
    for i, (fi, fo) in enumerate(dims):
        params[f"conv{i+1}_wl"] = kaiming_uniform(keys[2 * i], fi, fo)
        params[f"conv{i+1}_wr"] = kaiming_uniform(keys[2 * i + 1], fi, fo)
        params[f"conv{i+1}_b"] = jnp.zeros((1, fo), jnp.float32)
    params["fc1_w"] = kaiming_uniform(keys[6], H_3, 32)
    params["fc1_b"] = jnp.zeros((1, 32), jnp.float32)
    params["fc2_w"] = kaiming_uniform(keys[7], 32, 1)
    params["fc2_b"] = jnp.zeros((1, 1), jnp.float32)
    return params


def _pack_params(params):
    """Pad to 128 lanes, stack per-layer W_l/W_r, cast matmul operands to bf16."""
    ws, bs = [], []
    for i in range(1, NUM_LAYERS + 1):
        ws.append(_pad2(params[f"conv{i}_wl"], (F_PAD, F_PAD)))
        ws.append(_pad2(params[f"conv{i}_wr"], (F_PAD, F_PAD)))
        bs.append(_pad2(params[f"conv{i}_b"], (1, F_PAD)))
    w_stk = jnp.stack(ws).astype(jnp.bfloat16)          # (6, 128, 128)
    b_stk = jnp.stack(bs).astype(jnp.float32)           # (3, 1, 128)
    fc1_w = _pad2(params["fc1_w"], (F_PAD, F_PAD)).astype(jnp.bfloat16)
    fc1_b = _pad2(params["fc1_b"], (1, F_PAD)).astype(jnp.float32)
    fc2_w = _pad2(params["fc2_w"], (F_PAD, F_PAD)).astype(jnp.bfloat16)
    fc2_b = _pad2(params["fc2_b"], (1, F_PAD)).astype(jnp.float32)
    return w_stk, b_stk, fc1_w, fc1_b, fc2_w, fc2_b


# ----------------------------------------------------------------------------
# Host glue: bin-pack graphs into fixed TM-node chunks (block-diagonal layout).
# ----------------------------------------------------------------------------
def _pack_graphs(x_np, edge_index_np, batch_np, num_graphs):
    """Pack whole graphs into chunks of TM padded nodes.

    Assumes PyG batching contract: every edge connects nodes of the same graph.
    Returns host numpy arrays ready for the chunked kernel.
    """
    N = x_np.shape[0]
    counts = np.bincount(batch_np, minlength=num_graphs).astype(np.int64)
    max_g = int(counts.max()) if num_graphs > 0 else 1
    tm = max(_LANE, _round_up(max(max_g, 1), _LANE))   # lane-dense chunk size

    # Greedy packing of graphs (in id order) into chunks of capacity tm.
    chunk_of_graph = np.zeros(num_graphs, np.int64)
    base_of_graph = np.zeros(num_graphs, np.int64)
    cur_chunk, fill = 0, 0
    for g in range(num_graphs):
        c = int(counts[g])
        if fill + c > tm:
            cur_chunk += 1
            fill = 0
        chunk_of_graph[g] = cur_chunk
        base_of_graph[g] = fill
        fill += c
    num_chunks = cur_chunk + 1
    np_packed = num_chunks * tm

    # Packed slot for every original node (stable within each graph).
    order = np.argsort(batch_np, kind="stable")
    packed_idx = np.zeros(N, np.int64)
    pos = 0
    for g in range(num_graphs):
        c = int(counts[g])
        nodes = order[pos:pos + c]
        packed_idx[nodes] = chunk_of_graph[g] * tm + base_of_graph[g] + np.arange(c)
        pos += c

    x_p = np.zeros((np_packed, F_PAD), np.float32)
    x_p[packed_idx, : x_np.shape[1]] = x_np

    # Row-stacked diagonal adjacency blocks: rows = packed dst, cols = within-chunk src.
    a_p = np.zeros((np_packed, tm), np.float32)
    if edge_index_np.size:
        src, dst = edge_index_np[0], edge_index_np[1]
        np.add.at(a_p, (packed_idx[dst], packed_idx[src] % tm), 1.0)
    deg = a_p.sum(axis=1, keepdims=True)
    dinv = np.where(deg > 0, 1.0 / np.maximum(deg, 1.0), 0.0).astype(np.float32)

    g_pad = _round_up(max(num_graphs, 1), _SUBLANE)
    p_mem = np.zeros((g_pad, np_packed), np.float32)     # binary membership
    p_mem[batch_np, packed_idx] = 1.0
    inv_counts = np.zeros((g_pad, 1), np.float32)
    inv_counts[:num_graphs, 0] = 1.0 / np.maximum(counts, 1)

    return dict(tm=tm, num_chunks=num_chunks, packed_idx=packed_idx,
                x_p=x_p, a_p=a_p, dinv=dinv, p_mem=p_mem,
                inv_counts=inv_counts, g_pad=g_pad)


# ----------------------------------------------------------------------------
# Device pipeline: chunked SAGE kernel + tiny head kernel.
# ----------------------------------------------------------------------------
@jax.jit
def _fused_pipeline(a_p, dinv, x_p, p_mem, inv_counts,
                    w_stk, b_stk, fc1w, fc1b, fc2w, fc2b):
    tm = a_p.shape[1]
    num_chunks = a_p.shape[0] // tm
    np_packed = a_p.shape[0]
    g_pad = p_mem.shape[0]

    # Scoped-VMEM budget: double-buffered per-chunk blocks + resident weights
    # + f32 intermediates, with ~2x headroom (capped well below physical VMEM).
    per_chunk = (tm * tm * 2            # A block
                 + tm * F_PAD * 2       # x block
                 + tm * F_PAD * 4       # dinv (lane-padded, generous)
                 + g_pad * tm * 2       # P block
                 + tm * F_PAD * 2       # h3 out block
                 + g_pad * F_PAD * 4)   # pooled out block
    resident = w_stk.size * 2 + b_stk.size * 4
    interm = 4 * tm * F_PAD * 4
    vmem_limit = int(min(max(2 * (2 * per_chunk + resident + interm), 8 << 20),
                         100 << 20))

    flops = num_chunks * (
        NUM_LAYERS * (2 * tm * tm * F_PAD + 2 * 2 * tm * F_PAD * F_PAD)
        + 2 * g_pad * tm * F_PAD)
    bytes_accessed = (a_p.size * 2 + x_p.size * 2 + dinv.size * 4
                      + p_mem.size * 2 + w_stk.size * 2 + b_stk.size * 4
                      + np_packed * F_PAD * 2 + num_chunks * g_pad * F_PAD * 4)

    h3_packed, pooled_partial = pl.pallas_call(
        _sage_chunk_kernel,
        out_shape=(
            jax.ShapeDtypeStruct((np_packed, F_PAD), jnp.bfloat16),
            jax.ShapeDtypeStruct((num_chunks, g_pad, F_PAD), jnp.float32),
        ),
        grid_spec=pltpu.PrefetchScalarGridSpec(
            num_scalar_prefetch=0,
            grid=(num_chunks,),
            in_specs=[
                pl.BlockSpec((tm, tm), lambda c: (c, 0)),                     # A
                pl.BlockSpec((tm, 1), lambda c: (c, 0)),                      # 1/deg
                pl.BlockSpec((tm, F_PAD), lambda c: (c, 0)),                  # x
                pl.BlockSpec((g_pad, tm), lambda c: (0, c)),                  # P
                pl.BlockSpec((NUM_LAYERS * 2, F_PAD, F_PAD),
                             lambda c: (0, 0, 0)),                            # W (resident)
                pl.BlockSpec((NUM_LAYERS, 1, F_PAD), lambda c: (0, 0, 0)),    # b (resident)
            ],
            out_specs=(
                pl.BlockSpec((tm, F_PAD), lambda c: (c, 0)),                  # h3
                pl.BlockSpec((1, g_pad, F_PAD), lambda c: (c, 0, 0)),         # pooled partial
            ),
        ),
        compiler_params=pltpu.CompilerParams(
            dimension_semantics=("parallel",),
            vmem_limit_bytes=vmem_limit,
        ),
        cost_estimate=pl.CostEstimate(
            flops=int(flops), transcendentals=0, bytes_accessed=int(bytes_accessed)
        ),
    )(a_p, dinv, x_p, p_mem, w_stk, b_stk)

    out_pad = pl.pallas_call(
        _head_kernel,
        out_shape=jax.ShapeDtypeStruct((g_pad, F_PAD), jnp.float32),
        in_specs=[_VMEM] * 6,
        out_specs=_VMEM,
    )(pooled_partial, inv_counts, fc1w, fc1b, fc2w, fc2b)

    return out_pad, h3_packed


def graphsage_forward(params, x, edge_index, batch, num_graphs):
    meta = _pack_graphs(np.asarray(x), np.asarray(edge_index),
                        np.asarray(batch), num_graphs)
    w_stk, b_stk, fc1w, fc1b, fc2w, fc2b = _pack_params(params)
    out_pad, h3_packed = _fused_pipeline(
        jnp.asarray(meta["a_p"], jnp.bfloat16),
        jnp.asarray(meta["dinv"], jnp.float32),
        jnp.asarray(meta["x_p"], jnp.bfloat16),
        jnp.asarray(meta["p_mem"], jnp.bfloat16),
        jnp.asarray(meta["inv_counts"], jnp.float32),
        w_stk, b_stk, fc1w, fc1b, fc2w, fc2b,
    )
    out = out_pad[:num_graphs, :1]
    # TODO(synk): h3.register_hook (gradient capture) is backward-only; the
    # forward exposes h3 (== self.activations) instead.
    h3 = h3_packed[jnp.asarray(meta["packed_idx"]), :H_3].astype(jnp.float32)
    return out, h3


# ----------------------------------------------------------------------------
# Pure-JAX reference (f32) for a correctness check
# ----------------------------------------------------------------------------
def reference_forward(params, x, edge_index, batch, num_nodes, num_graphs):
    src, dst = edge_index[0], edge_index[1]
    adj = jnp.zeros((num_nodes, num_nodes), jnp.float32).at[dst, src].add(1.0)
    deg = adj.sum(axis=1, keepdims=True)
    a = jnp.where(deg > 0, adj / jnp.maximum(deg, 1.0), 0.0)
    onehot = (batch[None, :] == jnp.arange(num_graphs)[:, None]).astype(jnp.float32)
    p = onehot / jnp.maximum(onehot.sum(axis=1, keepdims=True), 1.0)
    h = x
    for i in range(1, NUM_LAYERS + 1):
        agg = a @ h
        h = jax.nn.relu(
            agg @ params[f"conv{i}_wl"] + h @ params[f"conv{i}_wr"] + params[f"conv{i}_b"]
        )
    pooled = p @ h
    z = jax.nn.relu(pooled @ params["fc1_w"] + params["fc1_b"])
    return z @ params["fc2_w"] + params["fc2_b"], h


# ----------------------------------------------------------------------------
# Demo
# ----------------------------------------------------------------------------
if __name__ == "__main__":
    key = jax.random.PRNGKey(0)
    k_param, k_x = jax.random.split(key)

    num_nodes = 16
    num_graphs = 2

    params = init_params(k_param)

    # Node features: (N, H_0)
    x = jax.random.normal(k_x, (num_nodes, H_0), dtype=jnp.float32)

    # Two graphs of 8 nodes each, each a bidirectional ring. edge_index: (2, E)
    edges = []
    for g in range(num_graphs):
        base = g * 8
        for i in range(8):
            s, d = base + i, base + (i + 1) % 8
            edges.append((s, d))
            edges.append((d, s))
    edge_index = jnp.array(edges, dtype=jnp.int32).T  # (2, 32)

    # Graph assignment per node.
    batch = jnp.array([0] * 8 + [1] * 8, dtype=jnp.int32)

    out, h3 = graphsage_forward(params, x, edge_index, batch, num_graphs)
    jax.block_until_ready(out)
    jax.block_until_ready(h3)

    assert out.shape == (num_graphs, 1)
    assert h3.shape == (num_nodes, H_3)

    # Exact-integer bf16 adjacency + f32 1/deg post-scale => only h/weight bf16
    # rounding remains, so the tolerance is tighter than the previous version.
    out_ref, h3_ref = reference_forward(
        params, x, edge_index, batch, num_nodes, num_graphs
    )
    assert jnp.allclose(out, out_ref, rtol=5e-2, atol=5e-2), (out, out_ref)
    assert jnp.allclose(h3, h3_ref, rtol=5e-2, atol=5e-2)

    print("KERNEL_OK")
</pallas_src>

<mosaic_0001>
module attributes {stable_mosaic.version = 11 : i64} {
  func.func @_sage_chunk_kernel(%arg0: i32, %arg1: memref<128x128xbf16, #tpu.memory_space<vmem>>, %arg2: memref<128x1xf32, #tpu.memory_space<vmem>>, %arg3: memref<128x128xbf16, #tpu.memory_space<vmem>>, %arg4: memref<8x128xbf16, #tpu.memory_space<vmem>>, %arg5: memref<6x128x128xbf16, #tpu.memory_space<vmem>>, %arg6: memref<3x1x128xf32, #tpu.memory_space<vmem>>, %arg7: memref<128x128xbf16, #tpu.memory_space<vmem>>, %arg8: memref<1x8x128xf32, #tpu.memory_space<vmem>>) attributes {dimension_semantics = [#tpu.dimension_semantics<parallel>], iteration_bounds = array<i64: 1>, scalar_prefetch = 0 : i64, scratch_operands = 0 : i64, tpu.core_type = #tpu.core_type<tc>, window_params = [{transform_indices = @transform_0, window_bounds = array<i64: 128, 128>}, {transform_indices = @transform_1, window_bounds = array<i64: 128, 1>}, {transform_indices = @transform_2, window_bounds = array<i64: 128, 128>}, {transform_indices = @transform_3, window_bounds = array<i64: 8, 128>}, {pipeline_mode = #tpu.pipeline_mode<synchronous>, transform_indices = @transform_4, window_bounds = array<i64: 6, 128, 128>}, {pipeline_mode = #tpu.pipeline_mode<synchronous>, transform_indices = @transform_5, window_bounds = array<i64: 3, 1, 128>}, {transform_indices = @transform_6, window_bounds = array<i64: 128, 128>}, {transform_indices = @transform_7, window_bounds = array<i64: 1, 8, 128>}]} {
    %c0 = arith.constant 0 : index
    %c0_0 = arith.constant 0 : index
    %0 = vector.load %arg1[%c0, %c0_0] : memref<128x128xbf16, #tpu.memory_space<vmem>>, vector<128x128xbf16>
    %c0_1 = arith.constant 0 : index
    %c0_2 = arith.constant 0 : index
    %1 = vector.load %arg2[%c0_1, %c0_2] : memref<128x1xf32, #tpu.memory_space<vmem>>, vector<128x1xf32>
    %c0_3 = arith.constant 0 : index
    %c0_4 = arith.constant 0 : index
    %2 = vector.load %arg3[%c0_3, %c0_4] : memref<128x128xbf16, #tpu.memory_space<vmem>>, vector<128x128xbf16>
    %cst = arith.constant dense<0.000000e+00> : vector<128x128xf32>
    %3 = tpu.matmul %0, %2, %cst {dimension_numbers = #tpu.dot_dimension_numbers<[1], [0], [0], [1], [0, 0, 1, 1], [], []>} : vector<128x128xbf16>, vector<128x128xbf16>, vector<128x128xf32> -> vector<128x128xf32>
    %4 = vector.broadcast %1 : vector<128x1xf32> to vector<128x128xf32>
    %5 = arith.mulf %3, %4 : vector<128x128xf32>
    %6 = arith.truncf %5 : vector<128x128xf32> to vector<128x128xbf16>
    %c0_5 = arith.constant 0 : index
    %c0_6 = arith.constant 0 : index
    %c0_7 = arith.constant 0 : index
    %7 = vector.load %arg5[%c0_5, %c0_6, %c0_7] : memref<6x128x128xbf16, #tpu.memory_space<vmem>>, vector<1x128x128xbf16>
    %8 = vector.shape_cast %7 : vector<1x128x128xbf16> to vector<128x128xbf16>
    %cst_8 = arith.constant dense<0.000000e+00> : vector<128x128xf32>
    %9 = tpu.matmul %6, %8, %cst_8 {dimension_numbers = #tpu.dot_dimension_numbers<[1], [0], [0], [1], [0, 0, 1, 1], [], []>} : vector<128x128xbf16>, vector<128x128xbf16>, vector<128x128xf32> -> vector<128x128xf32>
    %c1 = arith.constant 1 : index
    %c0_9 = arith.constant 0 : index
    %c0_10 = arith.constant 0 : index
    %10 = vector.load %arg5[%c1, %c0_9, %c0_10] : memref<6x128x128xbf16, #tpu.memory_space<vmem>>, vector<1x128x128xbf16>
    %11 = vector.shape_cast %10 : vector<1x128x128xbf16> to vector<128x128xbf16>
    %cst_11 = arith.constant dense<0.000000e+00> : vector<128x128xf32>
    %12 = tpu.matmul %2, %11, %cst_11 {dimension_numbers = #tpu.dot_dimension_numbers<[1], [0], [0], [1], [0, 0, 1, 1], [], []>} : vector<128x128xbf16>, vector<128x128xbf16>, vector<128x128xf32> -> vector<128x128xf32>
    %13 = arith.addf %9, %12 : vector<128x128xf32>
    %c0_12 = arith.constant 0 : index
    %c0_13 = arith.constant 0 : index
    %c0_14 = arith.constant 0 : index
    %14 = vector.load %arg6[%c0_12, %c0_13, %c0_14] : memref<3x1x128xf32, #tpu.memory_space<vmem>>, vector<1x1x128xf32>
    %15 = vector.shape_cast %14 : vector<1x1x128xf32> to vector<1x128xf32>
    %16 = vector.broadcast %15 : vector<1x128xf32> to vector<128x128xf32>
    %17 = arith.addf %13, %16 : vector<128x128xf32>
    %cst_15 = arith.constant 0.000000e+00 : f32
    %18 = vector.broadcast %cst_15 : f32 to vector<128x128xf32>
    %19 = arith.maximumf %17, %18 : vector<128x128xf32>
    %20 = arith.truncf %19 : vector<128x128xf32> to vector<128x128xbf16>
    %cst_16 = arith.constant dense<0.000000e+00> : vector<128x128xf32>
    %21 = tpu.matmul %0, %20, %cst_16 {dimension_numbers = #tpu.dot_dimension_numbers<[1], [0], [0], [1], [0, 0, 1, 1], [], []>} : vector<128x128xbf16>, vector<128x128xbf16>, vector<128x128xf32> -> vector<128x128xf32>
    %22 = vector.broadcast %1 : vector<128x1xf32> to vector<128x128xf32>
    %23 = arith.mulf %21, %22 : vector<128x128xf32>
    %24 = arith.truncf %23 : vector<128x128xf32> to vector<128x128xbf16>
    %c2 = arith.constant 2 : index
    %c0_17 = arith.constant 0 : index
    %c0_18 = arith.constant 0 : index
    %25 = vector.load %arg5[%c2, %c0_17, %c0_18] : memref<6x128x128xbf16, #tpu.memory_space<vmem>>, vector<1x128x128xbf16>
    %26 = vector.shape_cast %25 : vector<1x128x128xbf16> to vector<128x128xbf16>
    %cst_19 = arith.constant dense<0.000000e+00> : vector<128x128xf32>
    %27 = tpu.matmul %24, %26, %cst_19 {dimension_numbers = #tpu.dot_dimension_numbers<[1], [0], [0], [1], [0, 0, 1, 1], [], []>} : vector<128x128xbf16>, vector<128x128xbf16>, vector<128x128xf32> -> vector<128x128xf32>
    %c3 = arith.constant 3 : index
    %c0_20 = arith.constant 0 : index
    %c0_21 = arith.constant 0 : index
    %28 = vector.load %arg5[%c3, %c0_20, %c0_21] : memref<6x128x128xbf16, #tpu.memory_space<vmem>>, vector<1x128x128xbf16>
    %29 = vector.shape_cast %28 : vector<1x128x128xbf16> to vector<128x128xbf16>
    %cst_22 = arith.constant dense<0.000000e+00> : vector<128x128xf32>
    %30 = tpu.matmul %20, %29, %cst_22 {dimension_numbers = #tpu.dot_dimension_numbers<[1], [0], [0], [1], [0, 0, 1, 1], [], []>} : vector<128x128xbf16>, vector<128x128xbf16>, vector<128x128xf32> -> vector<128x128xf32>
    %31 = arith.addf %27, %30 : vector<128x128xf32>
    %c1_23 = arith.constant 1 : index
    %c0_24 = arith.constant 0 : index
    %c0_25 = arith.constant 0 : index
    %32 = vector.load %arg6[%c1_23, %c0_24, %c0_25] : memref<3x1x128xf32, #tpu.memory_space<vmem>>, vector<1x1x128xf32>
    %33 = vector.shape_cast %32 : vector<1x1x128xf32> to vector<1x128xf32>
    %34 = vector.broadcast %33 : vector<1x128xf32> to vector<128x128xf32>
    %35 = arith.addf %31, %34 : vector<128x128xf32>
    %cst_26 = arith.constant 0.000000e+00 : f32
    %36 = vector.broadcast %cst_26 : f32 to vector<128x128xf32>
    %37 = arith.maximumf %35, %36 : vector<128x128xf32>
    %38 = arith.truncf %37 : vector<128x128xf32> to vector<128x128xbf16>
    %cst_27 = arith.constant dense<0.000000e+00> : vector<128x128xf32>
    %39 = tpu.matmul %0, %38, %cst_27 {dimension_numbers = #tpu.dot_dimension_numbers<[1], [0], [0], [1], [0, 0, 1, 1], [], []>} : vector<128x128xbf16>, vector<128x128xbf16>, vector<128x128xf32> -> vector<128x128xf32>
    %40 = vector.broadcast %1 : vector<128x1xf32> to vector<128x128xf32>
    %41 = arith.mulf %39, %40 : vector<128x128xf32>
    %42 = arith.truncf %41 : vector<128x128xf32> to vector<128x128xbf16>
    %c4 = arith.constant 4 : index
    %c0_28 = arith.constant 0 : index
    %c0_29 = arith.constant 0 : index
    %43 = vector.load %arg5[%c4, %c0_28, %c0_29] : memref<6x128x128xbf16, #tpu.memory_space<vmem>>, vector<1x128x128xbf16>
    %44 = vector.shape_cast %43 : vector<1x128x128xbf16> to vector<128x128xbf16>
    %cst_30 = arith.constant dense<0.000000e+00> : vector<128x128xf32>
    %45 = tpu.matmul %42, %44, %cst_30 {dimension_numbers = #tpu.dot_dimension_numbers<[1], [0], [0], [1], [0, 0, 1, 1], [], []>} : vector<128x128xbf16>, vector<128x128xbf16>, vector<128x128xf32> -> vector<128x128xf32>
    %c5 = arith.constant 5 : index
    %c0_31 = arith.constant 0 : index
    %c0_32 = arith.constant 0 : index
    %46 = vector.load %arg5[%c5, %c0_31, %c0_32] : memref<6x128x128xbf16, #tpu.memory_space<vmem>>, vector<1x128x128xbf16>
    %47 = vector.shape_cast %46 : vector<1x128x128xbf16> to vector<128x128xbf16>
    %cst_33 = arith.constant dense<0.000000e+00> : vector<128x128xf32>
    %48 = tpu.matmul %38, %47, %cst_33 {dimension_numbers = #tpu.dot_dimension_numbers<[1], [0], [0], [1], [0, 0, 1, 1], [], []>} : vector<128x128xbf16>, vector<128x128xbf16>, vector<128x128xf32> -> vector<128x128xf32>
    %49 = arith.addf %45, %48 : vector<128x128xf32>
    %c2_34 = arith.constant 2 : index
    %c0_35 = arith.constant 0 : index
    %c0_36 = arith.constant 0 : index
    %50 = vector.load %arg6[%c2_34, %c0_35, %c0_36] : memref<3x1x128xf32, #tpu.memory_space<vmem>>, vector<1x1x128xf32>
    %51 = vector.shape_cast %50 : vector<1x1x128xf32> to vector<1x128xf32>
    %52 = vector.broadcast %51 : vector<1x128xf32> to vector<128x128xf32>
    %53 = arith.addf %49, %52 : vector<128x128xf32>
    %cst_37 = arith.constant 0.000000e+00 : f32
    %54 = vector.broadcast %cst_37 : f32 to vector<128x128xf32>
    %55 = arith.maximumf %53, %54 : vector<128x128xf32>
    %56 = arith.truncf %55 : vector<128x128xf32> to vector<128x128xbf16>
    %c0_38 = arith.constant 0 : index
    %c0_39 = arith.constant 0 : index
    %57 = vector.load %arg7[%c0_38, %c0_39] : memref<128x128xbf16, #tpu.memory_space<vmem>>, vector<128x128xbf16>
    tpu.vector_store %arg7[%c0_38, %c0_39], %56 {strides = array<i32>} : memref<128x128xbf16, #tpu.memory_space<vmem>>, vector<128x128xbf16>,
    %c0_40 = arith.constant 0 : index
    %c0_41 = arith.constant 0 : index
    %58 = vector.load %arg4[%c0_40, %c0_41] : memref<8x128xbf16, #tpu.memory_space<vmem>>, vector<8x128xbf16>
    %cst_42 = arith.constant dense<0.000000e+00> : vector<8x128xf32>
    %59 = tpu.matmul %58, %56, %cst_42 {dimension_numbers = #tpu.dot_dimension_numbers<[1], [0], [0], [1], [0, 0, 1, 1], [], []>} : vector<8x128xbf16>, vector<128x128xbf16>, vector<8x128xf32> -> vector<8x128xf32>
    %c0_43 = arith.constant 0 : index
    %c0_44 = arith.constant 0 : index
    %c0_45 = arith.constant 0 : index
    %60 = vector.load %arg8[%c0_43, %c0_44, %c0_45] : memref<1x8x128xf32, #tpu.memory_space<vmem>>, vector<1x8x128xf32>
    %61 = vector.shape_cast %60 : vector<1x8x128xf32> to vector<8x128xf32>
    %62 = vector.shape_cast %59 : vector<8x128xf32> to vector<1x8x128xf32>
    tpu.vector_store %arg8[%c0_43, %c0_44, %c0_45], %62 {strides = array<i32>} : memref<1x8x128xf32, #tpu.memory_space<vmem>>, vector<1x8x128xf32>,
    return
  }
  func.func @transform_0(%arg0: i32) -> (i32, i32) {
    %c0_i32 = arith.constant 0 : i32
    %c0_i32_0 = arith.constant 0 : i32
    return %arg0, %c0_i32 : i32, i32
  }
  func.func @transform_1(%arg0: i32) -> (i32, i32) {
    %c0_i32 = arith.constant 0 : i32
    %c0_i32_0 = arith.constant 0 : i32
    return %arg0, %c0_i32 : i32, i32
  }
  func.func @transform_2(%arg0: i32) -> (i32, i32) {
    %c0_i32 = arith.constant 0 : i32
    %c0_i32_0 = arith.constant 0 : i32
    return %arg0, %c0_i32 : i32, i32
  }
  func.func @transform_3(%arg0: i32) -> (i32, i32) {
    %c0_i32 = arith.constant 0 : i32
    %c0_i32_0 = arith.constant 0 : i32
    return %c0_i32, %arg0 : i32, i32
  }
  func.func @transform_4(%arg0: i32) -> (i32, i32, i32) {
    %c0_i32 = arith.constant 0 : i32
    %c0_i32_0 = arith.constant 0 : i32
    %c0_i32_1 = arith.constant 0 : i32
    %c0_i32_2 = arith.constant 0 : i32
    return %c0_i32, %c0_i32_0, %c0_i32_1 : i32, i32, i32
  }
  func.func @transform_5(%arg0: i32) -> (i32, i32, i32) {
    %c0_i32 = arith.constant 0 : i32
    %c0_i32_0 = arith.constant 0 : i32
    %c0_i32_1 = arith.constant 0 : i32
    %c0_i32_2 = arith.constant 0 : i32
    return %c0_i32, %c0_i32_0, %c0_i32_1 : i32, i32, i32
  }
  func.func @transform_6(%arg0: i32) -> (i32, i32) {
    %c0_i32 = arith.constant 0 : i32
    %c0_i32_0 = arith.constant 0 : i32
    return %arg0, %c0_i32 : i32, i32
  }
  func.func @transform_7(%arg0: i32) -> (i32, i32, i32) {
    %c0_i32 = arith.constant 0 : i32
    %c0_i32_0 = arith.constant 0 : i32
    %c0_i32_1 = arith.constant 0 : i32
    return %arg0, %c0_i32, %c0_i32_0 : i32, i32, i32
  }
}

module attributes {stable_mosaic.version = 11 : i64} {
  func.func @_head_kernel(%arg0: memref<1x8x128xf32, #tpu.memory_space<vmem>>, %arg1: memref<8x1xf32, #tpu.memory_space<vmem>>, %arg2: memref<128x128xbf16, #tpu.memory_space<vmem>>, %arg3: memref<1x128xf32, #tpu.memory_space<vmem>>, %arg4: memref<128x128xbf16, #tpu.memory_space<vmem>>, %arg5: memref<1x128xf32, #tpu.memory_space<vmem>>, %arg6: memref<8x128xf32, #tpu.memory_space<vmem>>) attributes {dimension_semantics = [], scalar_prefetch = 0 : i64, scratch_operands = 0 : i64, tpu.core_type = #tpu.core_type<tc>} {
    %c0 = arith.constant 0 : index
    %c0_0 = arith.constant 0 : index
    %c0_1 = arith.constant 0 : index
    %0 = vector.load %arg0[%c0, %c0_0, %c0_1] : memref<1x8x128xf32, #tpu.memory_space<vmem>>, vector<1x8x128xf32>
    %1 = vector.shape_cast %0 : vector<1x8x128xf32> to vector<8x128xf32>
    %c0_2 = arith.constant 0 : index
    %c0_3 = arith.constant 0 : index
    %2 = vector.load %arg1[%c0_2, %c0_3] : memref<8x1xf32, #tpu.memory_space<vmem>>, vector<8x1xf32>
    %3 = vector.broadcast %2 : vector<8x1xf32> to vector<8x128xf32>
    %4 = arith.mulf %1, %3 : vector<8x128xf32>
    %5 = arith.truncf %4 : vector<8x128xf32> to vector<8x128xbf16>
    %c0_4 = arith.constant 0 : index
    %c0_5 = arith.constant 0 : index
    %6 = vector.load %arg2[%c0_4, %c0_5] : memref<128x128xbf16, #tpu.memory_space<vmem>>, vector<128x128xbf16>
    %cst = arith.constant dense<0.000000e+00> : vector<8x128xf32>
    %7 = tpu.matmul %5, %6, %cst {dimension_numbers = #tpu.dot_dimension_numbers<[1], [0], [0], [1], [0, 0, 1, 1], [], []>} : vector<8x128xbf16>, vector<128x128xbf16>, vector<8x128xf32> -> vector<8x128xf32>
    %c0_6 = arith.constant 0 : index
    %c0_7 = arith.constant 0 : index
    %8 = vector.load %arg3[%c0_6, %c0_7] : memref<1x128xf32, #tpu.memory_space<vmem>>, vector<1x128xf32>
    %9 = vector.broadcast %8 : vector<1x128xf32> to vector<8x128xf32>
    %10 = arith.addf %7, %9 : vector<8x128xf32>
    %cst_8 = arith.constant 0.000000e+00 : f32
    %11 = vector.broadcast %cst_8 : f32 to vector<8x128xf32>
    %12 = arith.maximumf %10, %11 : vector<8x128xf32>
    %13 = arith.truncf %12 : vector<8x128xf32> to vector<8x128xbf16>
    %c0_9 = arith.constant 0 : index
    %c0_10 = arith.constant 0 : index
    %14 = vector.load %arg4[%c0_9, %c0_10] : memref<128x128xbf16, #tpu.memory_space<vmem>>, vector<128x128xbf16>
    %cst_11 = arith.constant dense<0.000000e+00> : vector<8x128xf32>
    %15 = tpu.matmul %13, %14, %cst_11 {dimension_numbers = #tpu.dot_dimension_numbers<[1], [0], [0], [1], [0, 0, 1, 1], [], []>} : vector<8x128xbf16>, vector<128x128xbf16>, vector<8x128xf32> -> vector<8x128xf32>
    %c0_12 = arith.constant 0 : index
    %c0_13 = arith.constant 0 : index
    %16 = vector.load %arg5[%c0_12, %c0_13] : memref<1x128xf32, #tpu.memory_space<vmem>>, vector<1x128xf32>
    %17 = vector.broadcast %16 : vector<1x128xf32> to vector<8x128xf32>
    %18 = arith.addf %15, %17 : vector<8x128xf32>
    %c0_14 = arith.constant 0 : index
    %c0_15 = arith.constant 0 : index
    %19 = vector.load %arg6[%c0_14, %c0_15] : memref<8x128xf32, #tpu.memory_space<vmem>>, vector<8x128xf32>
    tpu.vector_store %arg6[%c0_14, %c0_15], %18 {strides = array<i32>} : memref<8x128xf32, #tpu.memory_space<vmem>>, vector<8x128xf32>,
    return
  }
}

</mosaic_0001>

<bundles_post_ra>
// kernel: _fused_pipeline.3
= control target key start
LH: loop header
LB: loop body
LE: loop exit
PB: predicated region body
PF: predicated region fallthrough
CT: control target
= control target key end

     0   :  { %v325_v2 = vmov 0   ;;  %s425_s0 = inlined_call_operand.vmem [shape: f32[1,8,128], index: 0, kind: input, shape index: {}]   ;;  %s426_s1 = inlined_call_operand.vmem [shape: f32[8,1], index: 1, kind: input, shape index: {}]   ;;  %s427_s2 = inlined_call_operand.vmem [shape: bf16[128,128], index: 2, kind: input, shape index: {}]   ;;  %s428_s3 = inlined_call_operand.vmem [shape: f32[1,128], index: 3, kind: input, shape index: {}]   ;;  %s429_s4 = inlined_call_operand.vmem [shape: bf16[128,128], index: 4, kind: input, shape index: {}]   ;;  %s430_s5 = inlined_call_operand.vmem [shape: f32[1,128], index: 5, kind: input, shape index: {}]   ;;  %s431_s6 = inlined_call_operand.hbm [shape: f32[8,128], index: 6, kind: output, shape index: {}]  }
   0x1   :  { %v25_v0 = vld [vmem:[%s426_s1] sm:$0xff]  ;;  %v285_v1 = vld [vmem:[%s427_s2 + $0x38] sm:$0xff]  ;;  %296 = vset.pattern.permute.xlu0 %v325_v2  ;;  %v284_v3 = vld [vmem:[%s427_s2 + $0x30] sm:$0xff] }
   0x2   :  { %28 = vperm.xlu0 %296, %v25_v0   ;;  %101 = vmatpush.bf16.msra.mxu0 %v285_v1 }
   0x3   :  { %11 = vsyncpa [#allocation3], 0  ;;  %v283_v4 = vld [vmem:[%s427_s2 + $0x28] sm:$0xff]  ;;  %v282_v5 = vld [vmem:[%s427_s2 + $0x20] sm:$0xff]  ;;  %s326_s9 = smov [#allocation2]  }
   0x4   :  { %v281_v6 = vld [vmem:[%s427_s2 + $0x18] sm:$0xff]  ;;  %v280_v7 = vld [vmem:[%s427_s2 + $0x10] sm:$0xff]  ;;  %v279_v8 = vld [vmem:[%s427_s2 + $0x8] sm:$0xff]  ;;  %s203_s10 = sshll.u32 %s326_s9, 4  ;;  %s204_s10 = int_to_ptr.vmem [resolvable:$true] %s203_s10 }
   0x5   :  { %v278_v9 = vld [vmem:[%s427_s2] sm:$0xff]  ;;  %v293_v10 = vld [vmem:[%s429_s4 + $0x38] sm:$0xff]  ;;  %v292_v11 = vld [vmem:[%s429_s4 + $0x30] sm:$0xff] }
   0x6   :  { %102 = vmatpush.bf16.msra.mxu0 %v284_v3  ;;  %184 = vmatpush.bf16.msra.mxu1 %v293_v10  ;;  %v291_v12 = vld [vmem:[%s429_s4 + $0x28] sm:$0xff]  ;;  %v290_v13 = vld [vmem:[%s429_s4 + $0x20] sm:$0xff]  ;;  %v289_v14 = vld [vmem:[%s429_s4 + $0x18] sm:$0xff] }
   0x7   :  { %v288_v15 = vld [vmem:[%s429_s4 + $0x10] sm:$0xff]  ;;  %v24_v16 = vld [vmem:[%s425_s0] sm:$0xff]  ;;  %v287_v20 = vld [vmem:[%s429_s4 + $0x8] sm:$0xff] }
   0x8   :  { %v286_v21 = vld [vmem:[%s429_s4] sm:$0xff]  ;;  %s205_s4 = sshll.u32 %s431_s6, 4  ;;  %s206_s4 = int_to_ptr.hbm [resolvable:$true] %s205_s4 }
   0x9   :  { %v297_v22 = vld [vmem:[%s428_s3] ss:$0 sm:$0xff] }
   0xa   :  { %103 = vmatpush.bf16.msra.mxu0 %v283_v4  ;;  %185 = vmatpush.bf16.msra.mxu1 %v292_v11  ;;  %v298_v28 = vld [vmem:[%s430_s5] ss:$0 sm:$0xff] }
   0xe   :  { %104 = vmatpush.bf16.msra.mxu0 %v282_v5  ;;  %186 = vmatpush.bf16.msra.mxu1 %v291_v12 }
  0x12   :  { %105 = vmatpush.bf16.msra.mxu0 %v281_v6  ;;  %187 = vmatpush.bf16.msra.mxu1 %v290_v13 }
  0x16   :  { %106 = vmatpush.bf16.msra.mxu0 %v280_v7  ;;  %188 = vmatpush.bf16.msra.mxu1 %v289_v14 }
  0x1a   :  { %107 = vmatpush.bf16.msra.mxu0 %v279_v8  ;;  %189 = vmatpush.bf16.msra.mxu1 %v288_v15 }
  0x1e   :  { %108 = vmatpush.bf16.msra.mxu0 %v278_v9  ;;  %190 = vmatpush.bf16.msra.mxu1 %v287_v20 }
  0x22   :  { %191 = vmatpush.bf16.msra.mxu1 %v286_v21 }
  0x74   :  { %v29_v17 = vpop.permute.xlu0 %28 }
  0x75   :  { %v31_v18 = vmul.f32 %v29_v17, %v24_v16 }
  0x77   :  { %v32_v19 = vpack.c.bf16 %v31_v18, %v31_v18 }
  0x79   :  { %109 = vmatmul.bf16.vlgmr.msra.gmra.mxu0 %v32_v19 }
  0xf6   :  { %v110_v23 = vpop.f32.mrf.mxu0 }
  0xf7   :  { %v111_v24 = vadd.f32 %v297_v22, %v110_v23 }
  0xf9   :  { %v114_v25 = vmax.f32 %v111_v24, 0.0 }
  0xfb   :  { %v115_v26 = vpack.c.bf16 %v114_v25, %v114_v25 }
  0xfd   :  { %192 = vmatmul.bf16.vlgmr.msra.gmra.mxu1 %v115_v26 }
  0xfe   :  { %v112_v27 = vpop.f32.mrf.mxu0 }
 0x17a   :  { %v193_v29 = vpop.f32.mrf.mxu1 }
 0x17b   :  { %v194_v30 = vadd.f32 %v298_v28, %v193_v29 }
 0x17d   :  { %197 = vst [vmem:[#allocation2] sm:$0xff] %v194_v30 }
 0x17e   :  { %208 = dma.vmem_to_hbm [thread:$0]  %s204_s10, 128, %s206_s4, [#allocation3]  }
 0x182   :  { %v195_v31 = vpop.f32.mrf.mxu1 }
 0x183   :  { %323 = dma.done.wait [#allocation3], 128  }
 0x184   :  { %324 = vsyncadd [#allocation3], 4294967168 }
 0x185   :  { %213 = vsyncpa [#allocation3], 1 }

// kernel: _fused_pipeline.2
= control target key start
LH: loop header
LB: loop body
LE: loop exit
PB: predicated region body
PF: predicated region fallthrough
CT: control target
= control target key end

     0   :  { %13 = vsyncpa [#allocation3], 0  ;;  %s2310_s0 = inlined_call_operand.vmem [shape: bf16[128,128], index: 0, kind: input, shape index: {}]   ;;  %s2311_s1 = inlined_call_operand.vmem [shape: f32[128,1], index: 1, kind: input, shape index: {}]   ;;  %s2312_s2 = inlined_call_operand.vmem [shape: bf16[128,128], index: 2, kind: input, shape index: {}]   ;;  %s2313_s3 = inlined_call_operand.vmem [shape: bf16[8,128], index: 3, kind: input, shape index: {}]   ;;  %s2314_s4 = inlined_call_operand.hbm [shape: bf16[6,128,128], index: 4, kind: input, shape index: {}]   ;;  %s2315_s5 = inlined_call_operand.vmem [shape: f32[3,1,128], index: 5, kind: input, shape index: {}]   ;;  %s2316_s6 = inlined_call_operand.hbm [shape: bf16[128,128], index: 6, kind: output, shape index: {0}]   ;;  %s2317_s7 = inlined_call_operand.vmem [shape: f32[1,8,128], index: 7, kind: output, shape index: {1}]  }
   0x1   :  { %14 = vsyncpa [#allocation4], 0  ;;  %s27_s26 = sshll.u32 %s2314_s4, 4  ;;  %s1860_s27 = smov [#allocation2]   ;;  %s28_s26 = int_to_ptr.hbm [resolvable:$true] %s27_s26 }
   0x2   :  { %s29_s28 = sshll.u32 %s1860_s27, 4  ;;  %s1861_s29 = smov 64   ;;  %s30_s28 = int_to_ptr.vmem [resolvable:$true] %s29_s28 }
   0x3   :  { %s1862_s30 = smov 4  }
   0x4   :  { %35 = dma.hbm_to_vmem [thread:$0]  %s28_s26, 6144, %s30_s28, [#allocation3], %s1861_s29, %s1861_s29, %s1862_s30  }
   0x5   :  { %1856 = dma.done.wait [#allocation3], 6144  }
   0x6   :  { %1857 = vsyncadd [#allocation3], 4294961152  ;;  %v1863_v0 = vmov 0   ;;  %v1914_v1 = vld [vmem:[%s2312_s2 + $0x38] sm:$0xff]  ;;  %v58_v2 = vld [vmem:[%s2311_s1] sm:$0xff]  ;;  %s1864_s9 = smov [#allocation5]  }
   0x7   :  { %1802 = vset.pattern.permute.xlu0 %v1863_v0  ;;  %1803 = vset.pattern.permute.xlu1 %v1863_v0  ;;  %v1924_v3 = vld [vmem:[%s2312_s2 + $0x30] sm:$0xff]  ;;  %v1935_v5 = vld [vmem:[%s2312_s2 + $0x28] sm:$0xff]  ;;  %v61_v7 = vld [vmem:[%s2311_s1 + $0x18] sm:$0xff]  ;;  %s1393_s4 = sshll.u32 %s1864_s9, 4  ;;  %s1395_s12 = sshll.u32 %s2316_s6, 4  ;;  %s1394_s4 = int_to_ptr.vmem [resolvable:$true] %s1393_s4  ;;  %s1396_s12 = int_to_ptr.hbm [resolvable:$true] %s1395_s12 }
   0x8   :  { %1804 = vset.pattern.permute.xlu2 %v1863_v0  ;;  %237 = vperm.xlu0 %1802, %v58_v2   ;;  %v60_v4 = vld [vmem:[%s2311_s1 + $0x10] sm:$0xff]  ;;  %v59_v6 = vld [vmem:[%s2311_s1 + $0x8] sm:$0xff]  ;;  %v1949_v8 = vld [vmem:[%s2312_s2 + $0x20] sm:$0xff] }
   0x9   :  { %186 = vmatpush.bf16.msra.mxu0 %v1914_v1  ;;  %1781 = vmatpush.bf16.msra.mxu2 %v1914_v1  ;;  %v1957_v9 = vld [vmem:[%s2312_s2 + $0x18] sm:$0xff]  ;;  %v64_v10 = vld [vmem:[%s2311_s1 + $0x30] sm:$0xff]  ;;  %v62_v13 = vld [vmem:[%s2311_s1 + $0x20] sm:$0xff] }
   0xa   :  { %1782 = vmatpush.bf16.msra.mxu3 %v1914_v1  ;;  %247 = vperm.xlu1 %1803, %v60_v4   ;;  %v65_v11 = vld [vmem:[%s2311_s1 + $0x38] sm:$0xff]  ;;  %v1971_v12 = vld [vmem:[%s2312_s2 + $0x10] sm:$0xff]  ;;  %v1982_v14 = vld [vmem:[%s2312_s2 + $0x8] sm:$0xff] }
   0xb   :  { %257 = vperm.xlu2 %1804, %v62_v13   ;;  %v67_v15 = vld [vmem:[%s2311_s1 + $0x48] sm:$0xff]  ;;  %v68_v16 = vld [vmem:[%s2311_s1 + $0x50] sm:$0xff]  ;;  %v1996_v17 = vld [vmem:[%s2312_s2] sm:$0xff] }
   0xc   :  { %v2002_v18 = vld [vmem:[%s2310_s0] sm:$0xff]  ;;  %v2007_v19 = vld [vmem:[%s2310_s0 + $0x18] sm:$0xff]  ;;  %v2014_v20 = vld [vmem:[%s2310_s0 + $0x28] sm:$0xff] }
   0xd   :  { %187 = vmatpush.bf16.msra.mxu0 %v1924_v3  ;;  %1783 = vmatpush.bf16.msra.mxu2 %v1924_v3  ;;  %v70_v21 = vld [vmem:[%s2311_s1 + $0x60] sm:$0xff]  ;;  %v71_v22 = vld [vmem:[%s2311_s1 + $0x68] sm:$0xff]  ;;  %v73_v24 = vld [vmem:[%s2311_s1 + $0x78] sm:$0xff] }
   0xe   :  { %1784 = vmatpush.bf16.msra.mxu3 %v1924_v3  ;;  %v63_v23 = vld [vmem:[%s2311_s1 + $0x28] sm:$0xff]  ;;  %v66_v25 = vld [vmem:[%s2311_s1 + $0x40] sm:$0xff]  ;;  %v2048_v28 = vld [vmem:[%s2310_s0 + $0x30] sm:$0xff] }
   0xf   :  { %v2038_v26 = vld [vmem:[%s2310_s0 + $0x8] sm:$0xff]  ;;  %v2043_v27 = vld [vmem:[%s2310_s0 + $0x20] sm:$0xff]  ;;  %v69_v29 = vld [vmem:[%s2311_s1 + $0x58] sm:$0xff] }
  0x10   :  { %242 = vperm.xlu0 %1802, %v59_v6   ;;  %v72_v30 = vld [vmem:[%s2311_s1 + $0x70] sm:$0xff]  ;;  %v2067_v32 = vld [vmem:[%s2310_s0 + $0x38] sm:$0xff]  ;;  %v1699_v37 = vld [vmem:[#allocation2 + $0x68] sm:$0xff] }
  0x11   :  { %188 = vmatpush.bf16.msra.mxu0 %v1935_v5  ;;  %1785 = vmatpush.bf16.msra.mxu2 %v1935_v5  ;;  %v2062_v31 = vld [vmem:[%s2310_s0 + $0x10] sm:$0xff]  ;;  %v1701_v33 = vld [vmem:[#allocation2 + $0x78] sm:$0xff]  ;;  %v1691_v38 = vld [vmem:[#allocation2 + $0x28] sm:$0xff] }
  0x12   :  { %1786 = vmatpush.bf16.msra.mxu3 %v1935_v5  ;;  %252 = vperm.xlu1 %1803, %v61_v7   ;;  %v1693_v34 = vld [vmem:[#allocation2 + $0x38] sm:$0xff]  ;;  %v1700_v35 = vld [vmem:[#allocation2 + $0x70] sm:$0xff]  ;;  %v1698_v39 = vld [vmem:[#allocation2 + $0x60] sm:$0xff] }
  0x13   :  { %262 = vperm.xlu2 %1804, %v63_v23   ;;  %420 = vmatpush.bf16.msra.mxu1 %v1701_v33  ;;  %v1692_v36 = vld [vmem:[#allocation2 + $0x30] sm:$0xff]  ;;  %v1690_v40 = vld [vmem:[#allocation2 + $0x20] sm:$0xff]  ;;  %v1697_v41 = vld [vmem:[#allocation2 + $0x58] sm:$0xff] }
  0x14   :  { %v1689_v42 = vld [vmem:[#allocation2 + $0x18] sm:$0xff]  ;;  %v1696_v43 = vld [vmem:[#allocation2 + $0x50] sm:$0xff]  ;;  %v1695_v45 = vld [vmem:[#allocation2 + $0x48] sm:$0xff] }
  0x15   :  { %189 = vmatpush.bf16.msra.mxu0 %v1949_v8  ;;  %1787 = vmatpush.bf16.msra.mxu2 %v1949_v8  ;;  %v1688_v44 = vld [vmem:[#allocation2 + $0x10] sm:$0xff]  ;;  %v1687_v46 = vld [vmem:[#allocation2 + $0x8] sm:$0xff]  ;;  %v1694_v47 = vld [vmem:[#allocation2 + $0x40] sm:$0xff] }
  0x16   :  { %1788 = vmatpush.bf16.msra.mxu3 %v1949_v8  ;;  %v1686_v48 = vld [vmem:[#allocation2] sm:$0xff] }
  0x17   :  { %421 = vmatpush.bf16.msra.mxu1 %v1700_v35 }
  0x18   :  { %267 = vperm.xlu0 %1802, %v64_v10  }
  0x19   :  { %190 = vmatpush.bf16.msra.mxu0 %v1957_v9  ;;  %1789 = vmatpush.bf16.msra.mxu2 %v1957_v9 }
  0x1a   :  { %1790 = vmatpush.bf16.msra.mxu3 %v1957_v9  ;;  %272 = vperm.xlu1 %1803, %v65_v11  }
  0x1b   :  { %277 = vperm.xlu2 %1804, %v66_v25   ;;  %422 = vmatpush.bf16.msra.mxu1 %v1699_v37 }
  0x1d   :  { %191 = vmatpush.bf16.msra.mxu0 %v1971_v12  ;;  %1791 = vmatpush.bf16.msra.mxu2 %v1971_v12 }
  0x1e   :  { %1792 = vmatpush.bf16.msra.mxu3 %v1971_v12 }
  0x1f   :  { %423 = vmatpush.bf16.msra.mxu1 %v1698_v39  ;;  %v1716_v39 = vld [vmem:[#allocation2 + $0xf0] sm:$0xff] }
  0x20   :  { %282 = vperm.xlu0 %1802, %v67_v15  }
  0x21   :  { %192 = vmatpush.bf16.msra.mxu0 %v1982_v14  ;;  %1793 = vmatpush.bf16.msra.mxu2 %v1982_v14 }
  0x22   :  { %1794 = vmatpush.bf16.msra.mxu3 %v1982_v14  ;;  %287 = vperm.xlu1 %1803, %v68_v16  }
  0x23   :  { %292 = vperm.xlu2 %1804, %v69_v29   ;;  %424 = vmatpush.bf16.msra.mxu1 %v1697_v41 }
  0x25   :  { %193 = vmatpush.bf16.msra.mxu0 %v1996_v17  ;;  %1795 = vmatpush.bf16.msra.mxu2 %v1996_v17 }
  0x26   :  { %1796 = vmatpush.bf16.msra.mxu3 %v1996_v17 }
  0x27   :  { %425 = vmatpush.bf16.msra.mxu1 %v1696_v43  ;;  %v1714_v43 = vld [vmem:[#allocation2 + $0xe0] sm:$0xff] }
  0x28   :  { %194 = vmatmul.bf16.vlgmr.msra.gmra.mxu0 %v2002_v18  ;;  %209 = vmatmul.bf16.vlgmr.msra.gmra.mxu2 %v2007_v19 }
  0x29   :  { %219 = vmatmul.bf16.vlgmr.msra.gmra.mxu3 %v2014_v20  ;;  %297 = vperm.xlu0 %1802, %v70_v21  }
  0x2a   :  { %302 = vperm.xlu1 %1803, %v71_v22   ;;  %517 = vmatpush.bf16.msrb.mxu2 %v1693_v34 }
  0x2b   :  { %307 = vperm.xlu2 %1804, %v72_v30   ;;  %426 = vmatpush.bf16.msra.mxu1 %v1695_v45 }
  0x2e   :  { %518 = vmatpush.bf16.msrb.mxu2 %v1692_v36 }
  0x2f   :  { %427 = vmatpush.bf16.msra.mxu1 %v1694_v47 }
  0x31   :  { %312 = vperm.xlu0 %1802, %v73_v24  }
  0x32   :  { %519 = vmatpush.bf16.msrb.mxu2 %v1691_v38  ;;  %428 = vmatmul.bf16.vlgmr.msra.gmra.mxu1 %v1996_v17  ;;  %v1717_v38 = vld [vmem:[#allocation2 + $0xf8] sm:$0xff] }
  0x33   :  { %765 = vmatpush.bf16.msrb.mxu0 %v1717_v38 }
  0x36   :  { %520 = vmatpush.bf16.msrb.mxu2 %v1690_v40 }
  0x37   :  { %766 = vmatpush.bf16.msrb.mxu0 %v1716_v39 }
  0x38   :  { %199 = vmatmul.bf16.gmra.mxu0 %v2038_v26  ;;  %214 = vmatmul.bf16.gmra.mxu2 %v2043_v27 }
  0x39   :  { %224 = vmatmul.bf16.gmra.mxu3 %v2048_v28 }
  0x3a   :  { %521 = vmatpush.bf16.msrb.mxu2 %v1689_v42 }
  0x3e   :  { %522 = vmatpush.bf16.msrb.mxu2 %v1688_v44 }
  0x42   :  { %523 = vmatpush.bf16.msrb.mxu2 %v1687_v46  ;;  %433 = vmatmul.bf16.gmra.mxu1 %v1982_v14 }
  0x46   :  { %524 = vmatpush.bf16.msrb.mxu2 %v1686_v48 }
  0x48   :  { %204 = vmatmul.bf16.gmra.mxu0 %v2062_v31 }
  0x49   :  { %229 = vmatmul.bf16.gmra.mxu3 %v2067_v32 }
  0x52   :  { %438 = vmatmul.bf16.gmra.mxu1 %v1971_v12 }
  0x62   :  { %443 = vmatmul.bf16.gmra.mxu1 %v1957_v9 }
  0x65   :  { %v2087_v63 = vpop.permute.xlu2 %257 }
  0x6d   :  { %v2089_v4 = vpop.permute.xlu2 %262 }
  0x72   :  { %448 = vmatmul.bf16.gmra.mxu1 %v1949_v8 }
  0x75   :  { %v2103_v8 = vpop.permute.xlu2 %277 }
  0x7a   :  { %v2073_v49 = vpop.permute.xlu0 %237 }
  0x7c   :  { %v2080_v56 = vpop.permute.xlu1 %247 }
  0x7d   :  { %v2108_v33 = vpop.permute.xlu2 %292 }
  0x82   :  { %v2075_v51 = vpop.permute.xlu0 %242  ;;  %453 = vmatmul.bf16.gmra.mxu1 %v1935_v5 }
  0x84   :  { %v2082_v58 = vpop.permute.xlu1 %252 }
  0x8a   :  { %v2097_v14 = vpop.permute.xlu0 %267 }
  0x8c   :  { %v2094_v13 = vpop.permute.xlu1 %272 }
  0x92   :  { %v2101_v23 = vpop.permute.xlu0 %282  ;;  %458 = vmatmul.bf16.gmra.mxu1 %v1924_v3  ;;  %v1715_v3 = vld [vmem:[#allocation2 + $0xe8] sm:$0xff] }
  0x93   :  { %767 = vmatpush.bf16.msrb.mxu0 %v1715_v3 }
  0x94   :  { %v2110_v34 = vpop.permute.xlu1 %287 }
  0x97   :  { %768 = vmatpush.bf16.msrb.mxu0 %v1714_v43 }
  0x9b   :  { %v2118_v44 = vpop.permute.xlu0 %297 }
  0x9c   :  { %v2115_v41 = vpop.permute.xlu1 %302 }
  0xa2   :  { %463 = vmatmul.bf16.gmra.mxu1 %v1914_v1  ;;  %v1713_v1 = vld [vmem:[#allocation2 + $0xd8] sm:$0xff] }
  0xa3   :  { %769 = vmatpush.bf16.msrb.mxu0 %v1713_v1 }
  0xa5   :  { %v195_v50 = vpop.f32.mrf.mxu0 }
  0xa6   :  { %v315_v53 = vmul.f32 %v2073_v49, %v195_v50 }
  0xab   :  { %v210_v2 = vpop.f32.mrf.mxu2 }
  0xac   :  { %v321_v15 = vmul.f32 %v2097_v14, %v210_v2  ;;  %v220_v21 = vpop.f32.mrf.mxu3 }
  0xad   :  { %v197_v52 = vpop.f32.mrf.mxu0  ;;  %v325_v35 = vmul.f32 %v2110_v34, %v220_v21 }
  0xae   :  { %v316_v54 = vmul.f32 %v2075_v51, %v197_v52  ;;  %v1712_v52 = vld [vmem:[#allocation2 + $0xd0] sm:$0xff] }
  0xaf   :  { %v429_v48 = vpop.f32.mrf.mxu1  ;;  %770 = vmatpush.bf16.msrb.mxu0 %v1712_v52 }
  0xb0   :  { %v331_v55 = vpack.c.bf16 %v316_v54, %v315_v53  ;;  %v2121_v53 = vpop.permute.xlu0 %312 }
  0xb2   :  { %525 = vmatmul.bf16.vlgmr.msrb.gmra.mxu2 %v331_v55  ;;  %v2124_v55 = vpop.permute.xlu2 %307 }
  0xb3   :  { %v212_v12 = vpop.f32.mrf.mxu2 }
  0xb4   :  { %v322_v9 = vmul.f32 %v2094_v13, %v212_v12  ;;  %v222_v30 = vpop.f32.mrf.mxu3 }
  0xb5   :  { %v200_v57 = vpop.f32.mrf.mxu0  ;;  %v326_v36 = vmul.f32 %v2108_v33, %v222_v30 }
  0xb6   :  { %v317_v60 = vmul.f32 %v2080_v56, %v200_v57  ;;  %v334_v17 = vpack.c.bf16 %v322_v9, %v321_v15 }
  0xb7   :  { %v336_v37 = vpack.c.bf16 %v326_v36, %v325_v35 }
  0xbb   :  { %v215_v16 = vpop.f32.mrf.mxu2 }
  0xbc   :  { %v323_v24 = vmul.f32 %v2103_v8, %v215_v16  ;;  %v225_v5 = vpop.f32.mrf.mxu3 }
  0xbd   :  { %v202_v59 = vpop.f32.mrf.mxu0  ;;  %v327_v45 = vmul.f32 %v2118_v44, %v225_v5 }
  0xbe   :  { %v318_v61 = vmul.f32 %v2082_v58, %v202_v59  ;;  %v1711_v59 = vld [vmem:[#allocation2 + $0xc8] sm:$0xff] }
  0xbf   :  { %771 = vmatpush.bf16.msrb.mxu0 %v1711_v59 }
  0xc0   :  { %v332_v62 = vpack.c.bf16 %v318_v61, %v317_v60  ;;  %v431_v61 = vpop.f32.mrf.mxu1 }
  0xc2   :  { %530 = vmatmul.bf16.gmra.mxu2 %v332_v62  ;;  %v1710_v62 = vld [vmem:[#allocation2 + $0xc0] sm:$0xff] }
  0xc3   :  { %v217_v22 = vpop.f32.mrf.mxu2  ;;  %772 = vmatpush.bf16.msrb.mxu0 %v1710_v62 }
  0xc4   :  { %v324_v25 = vmul.f32 %v2101_v23, %v217_v22  ;;  %v227_v40 = vpop.f32.mrf.mxu3 }
  0xc5   :  { %v205_v0 = vpop.f32.mrf.mxu0  ;;  %v328_v42 = vmul.f32 %v2115_v41, %v227_v40 }
  0xc6   :  { %v319_v7 = vmul.f32 %v2087_v63, %v205_v0  ;;  %v335_v29 = vpack.c.bf16 %v324_v25, %v323_v24 }
  0xc7   :  { %v337_v47 = vpack.c.bf16 %v328_v42, %v327_v45 }
  0xc8   :  { %v434_v0 = vpop.f32.mrf.mxu1 }
  0xcc   :  { %v230_v46 = vpop.f32.mrf.mxu3 }
  0xcd   :  { %v207_v6 = vpop.f32.mrf.mxu0  ;;  %v329_v57 = vmul.f32 %v2124_v55, %v230_v46 }
  0xce   :  { %v320_v10 = vmul.f32 %v2089_v4, %v207_v6 }
  0xd0   :  { %v333_v11 = vpack.c.bf16 %v320_v10, %v319_v7  ;;  %v436_v6 = vpop.f32.mrf.mxu1  ;;  %v2130_v10 = vld [vmem:[%s2315_s5] ss:$0 sm:$0xff] }
  0xd2   :  { %535 = vmatmul.bf16.gmra.mxu2 %v333_v11 }
  0xd4   :  { %v232_v50 = vpop.f32.mrf.mxu3 }
  0xd5   :  { %v330_v54 = vmul.f32 %v2121_v53, %v232_v50 }
  0xd7   :  { %v338_v60 = vpack.c.bf16 %v330_v54, %v329_v57 }
  0xd8   :  { %v439_v15 = vpop.f32.mrf.mxu1 }
  0xe0   :  { %v441_v25 = vpop.f32.mrf.mxu1 }
  0xe2   :  { %540 = vmatmul.bf16.gmra.mxu2 %v334_v17 }
  0xe8   :  { %v444_v39 = vpop.f32.mrf.mxu1 }
  0xf0   :  { %v446_v45 = vpop.f32.mrf.mxu1 }
  0xf2   :  { %545 = vmatmul.bf16.gmra.mxu2 %v335_v29 }
  0xf8   :  { %v449_v57 = vpop.f32.mrf.mxu1 }
 0x102   :  { %550 = vmatmul.bf16.gmra.mxu2 %v336_v37 }
 0x112   :  { %555 = vmatmul.bf16.gmra.mxu2 %v337_v47 }
 0x122   :  { %560 = vmatmul.bf16.gmra.mxu2 %v338_v60 }
 0x135   :  { %v526_v2 = vpop.f32.mrf.mxu2 }
 0x136   :  { %v527_v7 = vadd.f32 %v526_v2, %v429_v48  ;;  %v451_v2 = vpop.f32.mrf.mxu1 }
 0x138   :  { %v570_v12 = vadd.f32 %v2130_v10, %v527_v7 }
 0x13a   :  { %v586_v17 = vmax.f32 %v570_v12, 0.0 }
 0x13d   :  { %v528_v11 = vpop.f32.mrf.mxu2 }
 0x13e   :  { %v529_v9 = vadd.f32 %v528_v11, %v431_v61 }
 0x140   :  { %v571_v16 = vadd.f32 %v2130_v10, %v529_v9 }
 0x142   :  { %v587_v21 = vmax.f32 %v571_v16, 0.0 }
 0x144   :  { %v2134_v22 = vpack.c.bf16 %v587_v21, %v586_v17 }
 0x145   :  { %v531_v24 = vpop.f32.mrf.mxu2 }
 0x146   :  { %773 = vmatmul.bf16.vlgmr.msrb.gmra.mxu0 %v2134_v22  ;;  %v532_v29 = vadd.f32 %v531_v24, %v434_v0 }
 0x148   :  { %v572_v5 = vadd.f32 %v2130_v10, %v532_v29 }
 0x14a   :  { %v588_v37 = vmax.f32 %v572_v5, 0.0 }
 0x14d   :  { %v533_v30 = vpop.f32.mrf.mxu2 }
 0x14e   :  { %v534_v35 = vadd.f32 %v533_v30, %v436_v6 }
 0x150   :  { %v573_v36 = vadd.f32 %v2130_v10, %v534_v35 }
 0x152   :  { %v589_v38 = vmax.f32 %v573_v36, 0.0 }
 0x154   :  { %v2139_v40 = vpack.c.bf16 %v589_v38, %v588_v37 }
 0x155   :  { %v536_v3 = vpop.f32.mrf.mxu2 }
 0x156   :  { %778 = vmatmul.bf16.gmra.mxu0 %v2139_v40  ;;  %v537_v42 = vadd.f32 %v536_v3, %v439_v15  ;;  %v454_v15 = vpop.f32.mrf.mxu1 }
 0x158   :  { %v574_v46 = vadd.f32 %v2130_v10, %v537_v42 }
 0x15a   :  { %v590_v48 = vmax.f32 %v574_v46, 0.0 }
 0x15d   :  { %v538_v43 = vpop.f32.mrf.mxu2 }
 0x15e   :  { %v539_v47 = vadd.f32 %v538_v43, %v441_v25  ;;  %v456_v5 = vpop.f32.mrf.mxu1 }
 0x160   :  { %v575_v1 = vadd.f32 %v2130_v10, %v539_v47 }
 0x162   :  { %v591_v50 = vmax.f32 %v575_v1, 0.0 }
 0x164   :  { %v2144_v52 = vpack.c.bf16 %v591_v50, %v590_v48 }
 0x165   :  { %v541_v54 = vpop.f32.mrf.mxu2 }
 0x166   :  { %783 = vmatmul.bf16.gmra.mxu0 %v2144_v52  ;;  %v542_v59 = vadd.f32 %v541_v54, %v444_v39  ;;  %v459_v3 = vpop.f32.mrf.mxu1 }
 0x168   :  { %v576_v61 = vadd.f32 %v2130_v10, %v542_v59 }
 0x16a   :  { %v592_v6 = vmax.f32 %v576_v61, 0.0 }
 0x16d   :  { %v543_v60 = vpop.f32.mrf.mxu2 }
 0x16e   :  { %v544_v62 = vadd.f32 %v543_v60, %v446_v45  ;;  %v461_v1 = vpop.f32.mrf.mxu1 }
 0x170   :  { %v577_v0 = vadd.f32 %v2130_v10, %v544_v62 }
 0x172   :  { %v593_v7 = vmax.f32 %v577_v0, 0.0 }
 0x174   :  { %v605_v11 = vpack.c.bf16 %v593_v7, %v592_v6 }
 0x175   :  { %v546_v12 = vpop.f32.mrf.mxu2 }
 0x176   :  { %788 = vmatmul.bf16.gmra.mxu0 %v605_v11  ;;  %v547_v9 = vadd.f32 %v546_v12, %v449_v57  ;;  %v464_v62 = vpop.f32.mrf.mxu1 }
 0x178   :  { %v578_v17 = vadd.f32 %v2130_v10, %v547_v9 }
 0x17a   :  { %v594_v25 = vmax.f32 %v578_v17, 0.0 }
 0x17d   :  { %v548_v16 = vpop.f32.mrf.mxu2 }
 0x17e   :  { %v549_v21 = vadd.f32 %v548_v16, %v451_v2  ;;  %v466_v7 = vpop.f32.mrf.mxu1 }
 0x180   :  { %v579_v24 = vadd.f32 %v2130_v10, %v549_v21 }
 0x182   :  { %v595_v29 = vmax.f32 %v579_v24, 0.0 }
 0x184   :  { %v606_v30 = vpack.c.bf16 %v595_v29, %v594_v25  ;;  %v1704_v25 = vld [vmem:[#allocation2 + $0x90] sm:$0xff]  ;;  %v1703_v29 = vld [vmem:[#allocation2 + $0x88] sm:$0xff] }
 0x185   :  { %v551_v35 = vpop.f32.mrf.mxu2 }
 0x186   :  { %793 = vmatmul.bf16.gmra.mxu0 %v606_v30  ;;  %v552_v36 = vadd.f32 %v551_v35, %v454_v15 }
 0x188   :  { %v580_v38 = vadd.f32 %v2130_v10, %v552_v36 }
 0x18a   :  { %v596_v43 = vmax.f32 %v580_v38, 0.0 }
 0x18d   :  { %v553_v37 = vpop.f32.mrf.mxu2 }
 0x18e   :  { %v554_v39 = vadd.f32 %v553_v37, %v456_v5 }
 0x190   :  { %v581_v42 = vadd.f32 %v2130_v10, %v554_v39 }
 0x192   :  { %v597_v45 = vmax.f32 %v581_v42, 0.0 }
 0x194   :  { %v607_v46 = vpack.c.bf16 %v597_v45, %v596_v43 }
 0x195   :  { %v556_v47 = vpop.f32.mrf.mxu2 }
 0x196   :  { %798 = vmatmul.bf16.gmra.mxu0 %v607_v46  ;;  %v557_v48 = vadd.f32 %v556_v47, %v459_v3 }
 0x198   :  { %v582_v54 = vadd.f32 %v2130_v10, %v557_v48 }
 0x19a   :  { %v598_v60 = vmax.f32 %v582_v54, 0.0 }
 0x19d   :  { %v558_v50 = vpop.f32.mrf.mxu2 }
 0x19e   :  { %v559_v57 = vadd.f32 %v558_v50, %v461_v1 }
 0x1a0   :  { %v583_v59 = vadd.f32 %v2130_v10, %v559_v57 }
 0x1a2   :  { %v599_v61 = vmax.f32 %v583_v59, 0.0 }
 0x1a4   :  { %v608_v0 = vpack.c.bf16 %v599_v61, %v598_v60 }
 0x1a5   :  { %v561_v2 = vpop.f32.mrf.mxu2 }
 0x1a6   :  { %803 = vmatmul.bf16.gmra.mxu0 %v608_v0  ;;  %v562_v6 = vadd.f32 %v561_v2, %v464_v62 }
 0x1a8   :  { %v584_v9 = vadd.f32 %v2130_v10, %v562_v6 }
 0x1aa   :  { %v600_v17 = vmax.f32 %v584_v9, 0.0 }
 0x1ad   :  { %v563_v12 = vpop.f32.mrf.mxu2 }
 0x1ae   :  { %v564_v15 = vadd.f32 %v563_v12, %v466_v7 }
 0x1b0   :  { %v585_v16 = vadd.f32 %v2130_v10, %v564_v15  ;;  %v1709_v10 = vld [vmem:[#allocation2 + $0xb8] sm:$0xff] }
 0x1b1   :  { %862 = vmatpush.bf16.msrb.mxu1 %v1709_v10 }
 0x1b2   :  { %v601_v21 = vmax.f32 %v585_v16, 0.0 }
 0x1b4   :  { %v609_v24 = vpack.c.bf16 %v601_v21, %v600_v17  ;;  %v1733_v21 = vld [vmem:[#allocation2 + $0x178] sm:$0xff] }
 0x1b6   :  { %610 = vmatpush.bf16.msrb.mxu3 %v609_v24  ;;  %808 = vmatmul.bf16.gmra.mxu0 %v609_v24  ;;  %v1732_v24 = vld [vmem:[#allocation2 + $0x170] sm:$0xff] }
 0x1ba   :  { %611 = vmatpush.bf16.msrb.mxu3 %v608_v0 }
 0x1be   :  { %612 = vmatpush.bf16.msrb.mxu3 %v607_v46 }
 0x1c2   :  { %613 = vmatpush.bf16.msrb.mxu3 %v606_v30  ;;  %v1702_v30 = vld [vmem:[#allocation2 + $0x80] sm:$0xff] }
 0x1c6   :  { %614 = vmatpush.bf16.msrb.mxu3 %v605_v11  ;;  %v1708_v11 = vld [vmem:[#allocation2 + $0xb0] sm:$0xff] }
 0x1c7   :  { %863 = vmatpush.bf16.msrb.mxu1 %v1708_v11  ;;  %v1731_v11 = vld [vmem:[#allocation2 + $0x168] sm:$0xff] }
 0x1ca   :  { %615 = vmatpush.bf16.msrb.mxu3 %v2144_v52  ;;  %v1707_v52 = vld [vmem:[#allocation2 + $0xa8] sm:$0xff] }
 0x1cb   :  { %864 = vmatpush.bf16.msrb.mxu1 %v1707_v52  ;;  %v1730_v52 = vld [vmem:[#allocation2 + $0x160] sm:$0xff] }
 0x1ce   :  { %616 = vmatpush.bf16.msrb.mxu3 %v2139_v40  ;;  %v1706_v40 = vld [vmem:[#allocation2 + $0xa0] sm:$0xff] }
 0x1cf   :  { %865 = vmatpush.bf16.msrb.mxu1 %v1706_v40 }
 0x1d2   :  { %617 = vmatpush.bf16.msrb.mxu3 %v2134_v22  ;;  %v1705_v22 = vld [vmem:[#allocation2 + $0x98] sm:$0xff] }
 0x1d3   :  { %866 = vmatpush.bf16.msrb.mxu1 %v1705_v22 }
 0x1d5   :  { %618 = vmatmul.bf16.vlgmr.msrb.gmra.mxu3 %v2002_v18 }
 0x1d6   :  { %1111 = vmatpush.bf16.msra.mxu3 %v1733_v21 }
 0x1d7   :  { %867 = vmatpush.bf16.msrb.mxu1 %v1704_v25 }
 0x1da   :  { %1112 = vmatpush.bf16.msra.mxu3 %v1732_v24 }
 0x1db   :  { %868 = vmatpush.bf16.msrb.mxu1 %v1703_v29 }
 0x1de   :  { %1113 = vmatpush.bf16.msra.mxu3 %v1731_v11 }
 0x1df   :  { %869 = vmatpush.bf16.msrb.mxu1 %v1702_v30  ;;  %v1729_v30 = vld [vmem:[#allocation2 + $0x158] sm:$0xff] }
 0x1e2   :  { %1114 = vmatpush.bf16.msra.mxu3 %v1730_v52 }
 0x1e5   :  { %623 = vmatmul.bf16.gmra.mxu3 %v2038_v26 }
 0x1e6   :  { %1115 = vmatpush.bf16.msra.mxu3 %v1729_v30 }
 0x1f5   :  { %628 = vmatmul.bf16.gmra.mxu3 %v2062_v31 }
 0x205   :  { %633 = vmatmul.bf16.gmra.mxu3 %v2007_v19 }
 0x215   :  { %638 = vmatmul.bf16.gmra.mxu3 %v2043_v27 }
 0x225   :  { %643 = vmatmul.bf16.gmra.mxu3 %v2014_v20 }
 0x235   :  { %648 = vmatmul.bf16.gmra.mxu3 %v2048_v28 }
 0x245   :  { %653 = vmatmul.bf16.gmra.mxu3 %v2067_v32 }
 0x258   :  { %v619_v5 = vpop.f32.mrf.mxu3 }
 0x259   :  { %v659_v36 = vmul.f32 %v619_v5, %v2073_v49  ;;  %v774_v5 = vpop.f32.mrf.mxu0 }
 0x260   :  { %v621_v35 = vpop.f32.mrf.mxu3 }
 0x261   :  { %v660_v37 = vmul.f32 %v621_v35, %v2075_v51  ;;  %v1728_v35 = vld [vmem:[#allocation2 + $0x150] sm:$0xff] }
 0x262   :  { %1116 = vmatpush.bf16.msra.mxu3 %v1728_v35 }
 0x263   :  { %v675_v38 = vpack.c.bf16 %v660_v37, %v659_v36  ;;  %v1727_v37 = vld [vmem:[#allocation2 + $0x148] sm:$0xff] }
 0x265   :  { %870 = vmatmul.bf16.vlgmr.msrb.gmra.mxu1 %v675_v38  ;;  %v776_v38 = vpop.f32.mrf.mxu0 }
 0x266   :  { %1117 = vmatpush.bf16.msra.mxu3 %v1727_v37 }
 0x268   :  { %v624_v39 = vpop.f32.mrf.mxu3 }
 0x269   :  { %v661_v42 = vmul.f32 %v624_v39, %v2080_v56  ;;  %v1726_v39 = vld [vmem:[#allocation2 + $0x140] sm:$0xff] }
 0x26a   :  { %1118 = vmatpush.bf16.msra.mxu3 %v1726_v39 }
 0x270   :  { %v626_v3 = vpop.f32.mrf.mxu3 }
 0x271   :  { %v662_v43 = vmul.f32 %v626_v3, %v2082_v58 }
 0x273   :  { %v676_v45 = vpack.c.bf16 %v662_v43, %v661_v42 }
 0x275   :  { %875 = vmatmul.bf16.gmra.mxu1 %v676_v45 }
 0x278   :  { %v629_v46 = vpop.f32.mrf.mxu3 }
 0x279   :  { %v663_v1 = vmul.f32 %v629_v46, %v2087_v63  ;;  %v779_v46 = vpop.f32.mrf.mxu0 }
 0x280   :  { %v631_v47 = vpop.f32.mrf.mxu3 }
 0x281   :  { %v664_v48 = vmul.f32 %v631_v47, %v2089_v4  ;;  %v781_v47 = vpop.f32.mrf.mxu0 }
 0x283   :  { %v677_v50 = vpack.c.bf16 %v664_v48, %v663_v1 }
 0x285   :  { %880 = vmatmul.bf16.gmra.mxu1 %v677_v50  ;;  %v2187_v50 = vld [vmem:[%s2315_s5 + $0x1] ss:$0 sm:$0xff] }
 0x288   :  { %v634_v54 = vpop.f32.mrf.mxu3 }
 0x289   :  { %v665_v59 = vmul.f32 %v634_v54, %v2097_v14 }
 0x290   :  { %v636_v57 = vpop.f32.mrf.mxu3 }
 0x291   :  { %v666_v60 = vmul.f32 %v636_v57, %v2094_v13 }
 0x293   :  { %v678_v61 = vpack.c.bf16 %v666_v60, %v665_v59  ;;  %v784_v60 = vpop.f32.mrf.mxu0 }
 0x295   :  { %885 = vmatmul.bf16.gmra.mxu1 %v678_v61 }
 0x298   :  { %v639_v62 = vpop.f32.mrf.mxu3 }
 0x299   :  { %v667_v2 = vmul.f32 %v639_v62, %v2103_v8 }
 0x2a0   :  { %v641_v0 = vpop.f32.mrf.mxu3 }
 0x2a1   :  { %v668_v6 = vmul.f32 %v641_v0, %v2101_v23 }
 0x2a3   :  { %v679_v7 = vpack.c.bf16 %v668_v6, %v667_v2 }
 0x2a5   :  { %890 = vmatmul.bf16.gmra.mxu1 %v679_v7  ;;  %v786_v7 = vpop.f32.mrf.mxu0 }
 0x2a8   :  { %v644_v12 = vpop.f32.mrf.mxu3 }
 0x2a9   :  { %v669_v15 = vmul.f32 %v644_v12, %v2110_v34 }
 0x2b0   :  { %v646_v9 = vpop.f32.mrf.mxu3 }
 0x2b1   :  { %v670_v16 = vmul.f32 %v646_v9, %v2108_v33 }
 0x2b3   :  { %v680_v17 = vpack.c.bf16 %v670_v16, %v669_v15 }
 0x2b5   :  { %895 = vmatmul.bf16.gmra.mxu1 %v680_v17 }
 0x2b8   :  { %v649_v10 = vpop.f32.mrf.mxu3 }
 0x2b9   :  { %v671_v22 = vmul.f32 %v649_v10, %v2118_v44  ;;  %v789_v10 = vpop.f32.mrf.mxu0 }
 0x2c0   :  { %v651_v40 = vpop.f32.mrf.mxu3 }
 0x2c1   :  { %v672_v25 = vmul.f32 %v651_v40, %v2115_v41 }
 0x2c3   :  { %v681_v29 = vpack.c.bf16 %v672_v25, %v671_v22  ;;  %v791_v22 = vpop.f32.mrf.mxu0 }
 0x2c5   :  { %900 = vmatmul.bf16.gmra.mxu1 %v681_v29 }
 0x2c8   :  { %v654_v36 = vpop.f32.mrf.mxu3 }
 0x2c9   :  { %v673_v42 = vmul.f32 %v654_v36, %v2124_v55 }
 0x2cb   :  { %v794_v39 = vpop.f32.mrf.mxu0 }
 0x2d0   :  { %v656_v3 = vpop.f32.mrf.mxu3 }
 0x2d1   :  { %v674_v43 = vmul.f32 %v656_v3, %v2121_v53 }
 0x2d3   :  { %v682_v45 = vpack.c.bf16 %v674_v43, %v673_v42 }
 0x2d5   :  { %905 = vmatmul.bf16.gmra.mxu1 %v682_v45 }
 0x2e2   :  { %v871_v1 = vpop.f32.mrf.mxu1 }
 0x2e3   :  { %v872_v48 = vadd.f32 %v871_v1, %v774_v5 }
 0x2e5   :  { %v916_v57 = vadd.f32 %v2187_v50, %v872_v48 }
 0x2e7   :  { %v932_v62 = vmax.f32 %v916_v57, 0.0 }
 0x2ea   :  { %v873_v54 = vpop.f32.mrf.mxu1 }
 0x2eb   :  { %v874_v59 = vadd.f32 %v873_v54, %v776_v38 }
 0x2ed   :  { %v917_v61 = vadd.f32 %v2187_v50, %v874_v59 }
 0x2ef   :  { %v933_v0 = vmax.f32 %v917_v61, 0.0 }
 0x2f1   :  { %v2191_v2 = vpack.c.bf16 %v933_v0, %v932_v62 }
 0x2f2   :  { %v876_v6 = vpop.f32.mrf.mxu1 }
 0x2f3   :  { %1119 = vmatmul.bf16.vlgmr.msra.gmra.mxu3 %v2191_v2  ;;  %v877_v12 = vadd.f32 %v876_v6, %v779_v46 }
 0x2f5   :  { %v918_v15 = vadd.f32 %v2187_v50, %v877_v12 }
 0x2f7   :  { %v934_v21 = vmax.f32 %v918_v15, 0.0 }
 0x2fa   :  { %v878_v9 = vpop.f32.mrf.mxu1 }
 0x2fb   :  { %v879_v16 = vadd.f32 %v878_v9, %v781_v47  ;;  %v796_v47 = vpop.f32.mrf.mxu0 }
 0x2fd   :  { %v919_v17 = vadd.f32 %v2187_v50, %v879_v16 }
 0x2ff   :  { %v935_v24 = vmax.f32 %v919_v17, 0.0 }
 0x301   :  { %v2196_v11 = vpack.c.bf16 %v935_v24, %v934_v21 }
 0x302   :  { %v881_v52 = vpop.f32.mrf.mxu1 }
 0x303   :  { %1124 = vmatmul.bf16.gmra.mxu3 %v2196_v11  ;;  %v882_v40 = vadd.f32 %v881_v52, %v784_v60  ;;  %v799_v60 = vpop.f32.mrf.mxu0 }
 0x305   :  { %v920_v29 = vadd.f32 %v2187_v50, %v882_v40 }
 0x307   :  { %v936_v35 = vmax.f32 %v920_v29, 0.0 }
 0x30a   :  { %v883_v25 = vpop.f32.mrf.mxu1 }
 0x30b   :  { %v884_v30 = vadd.f32 %v883_v25, %v786_v7  ;;  %v801_v15 = vpop.f32.mrf.mxu0 }
 0x30d   :  { %v921_v5 = vadd.f32 %v2187_v50, %v884_v30 }
 0x30f   :  { %v937_v36 = vmax.f32 %v921_v5, 0.0 }
 0x311   :  { %v2201_v37 = vpack.c.bf16 %v937_v36, %v936_v35 }
 0x312   :  { %v886_v38 = vpop.f32.mrf.mxu1 }
 0x313   :  { %1129 = vmatmul.bf16.gmra.mxu3 %v2201_v37  ;;  %v887_v3 = vadd.f32 %v886_v38, %v789_v10  ;;  %v804_v52 = vpop.f32.mrf.mxu0 }
 0x315   :  { %v922_v43 = vadd.f32 %v2187_v50, %v887_v3 }
 0x317   :  { %v938_v1 = vmax.f32 %v922_v43, 0.0 }
 0x31a   :  { %v888_v42 = vpop.f32.mrf.mxu1 }
 0x31b   :  { %v889_v45 = vadd.f32 %v888_v42, %v791_v22  ;;  %v806_v5 = vpop.f32.mrf.mxu0 }
 0x31d   :  { %v923_v46 = vadd.f32 %v2187_v50, %v889_v45 }
 0x31f   :  { %v939_v48 = vmax.f32 %v923_v46, 0.0 }
 0x321   :  { %v951_v54 = vpack.c.bf16 %v939_v48, %v938_v1 }
 0x322   :  { %v891_v57 = vpop.f32.mrf.mxu1 }
 0x323   :  { %1134 = vmatmul.bf16.gmra.mxu3 %v951_v54  ;;  %v892_v59 = vadd.f32 %v891_v57, %v794_v39  ;;  %v809_v45 = vpop.f32.mrf.mxu0 }
 0x325   :  { %v924_v62 = vadd.f32 %v2187_v50, %v892_v59 }
 0x327   :  { %v940_v7 = vmax.f32 %v924_v62, 0.0 }
 0x32a   :  { %v893_v61 = vpop.f32.mrf.mxu1 }
 0x32b   :  { %v894_v0 = vadd.f32 %v893_v61, %v796_v47  ;;  %v811_v48 = vpop.f32.mrf.mxu0 }
 0x32d   :  { %v925_v6 = vadd.f32 %v2187_v50, %v894_v0 }
 0x32f   :  { %v941_v12 = vmax.f32 %v925_v6, 0.0 }
 0x331   :  { %v952_v9 = vpack.c.bf16 %v941_v12, %v940_v7 }
 0x332   :  { %v896_v16 = vpop.f32.mrf.mxu1 }
 0x333   :  { %1139 = vmatmul.bf16.gmra.mxu3 %v952_v9  ;;  %v897_v17 = vadd.f32 %v896_v16, %v799_v60 }
 0x335   :  { %v926_v24 = vadd.f32 %v2187_v50, %v897_v17 }
 0x337   :  { %v942_v22 = vmax.f32 %v926_v24, 0.0 }
 0x33a   :  { %v898_v21 = vpop.f32.mrf.mxu1 }
 0x33b   :  { %v899_v10 = vadd.f32 %v898_v21, %v801_v15 }
 0x33d   :  { %v927_v40 = vadd.f32 %v2187_v50, %v899_v10 }
 0x33f   :  { %v943_v25 = vmax.f32 %v927_v40, 0.0 }
 0x341   :  { %v953_v29 = vpack.c.bf16 %v943_v25, %v942_v22 }
 0x342   :  { %v901_v30 = vpop.f32.mrf.mxu1 }
 0x343   :  { %1144 = vmatmul.bf16.gmra.mxu3 %v953_v29  ;;  %v902_v35 = vadd.f32 %v901_v30, %v804_v52 }
 0x345   :  { %v928_v38 = vadd.f32 %v2187_v50, %v902_v35 }
 0x347   :  { %v944_v42 = vmax.f32 %v928_v38, 0.0 }
 0x34a   :  { %v903_v36 = vpop.f32.mrf.mxu1 }
 0x34b   :  { %v904_v39 = vadd.f32 %v903_v36, %v806_v5 }
 0x34d   :  { %v929_v3 = vadd.f32 %v2187_v50, %v904_v39 }
 0x34f   :  { %v945_v43 = vmax.f32 %v929_v3, 0.0 }
 0x351   :  { %v954_v46 = vpack.c.bf16 %v945_v43, %v944_v42 }
 0x352   :  { %v906_v47 = vpop.f32.mrf.mxu1 }
 0x353   :  { %1149 = vmatmul.bf16.gmra.mxu3 %v954_v46  ;;  %v907_v1 = vadd.f32 %v906_v47, %v809_v45 }
 0x355   :  { %v930_v59 = vadd.f32 %v2187_v50, %v907_v1 }
 0x357   :  { %v946_v62 = vmax.f32 %v930_v59, 0.0 }
 0x35a   :  { %v908_v57 = vpop.f32.mrf.mxu1 }
 0x35b   :  { %v909_v60 = vadd.f32 %v908_v57, %v811_v48 }
 0x35d   :  { %v931_v61 = vadd.f32 %v2187_v50, %v909_v60  ;;  %v1725_v50 = vld [vmem:[#allocation2 + $0x138] sm:$0xff] }
 0x35e   :  { %1208 = vmatpush.bf16.msra.mxu0 %v1725_v50 }
 0x35f   :  { %v947_v0 = vmax.f32 %v931_v61, 0.0 }
 0x361   :  { %v955_v6 = vpack.c.bf16 %v947_v0, %v946_v62 }
 0x363   :  { %956 = vmatpush.bf16.msra.mxu2 %v955_v6  ;;  %1154 = vmatmul.bf16.gmra.mxu3 %v955_v6 }
 0x367   :  { %957 = vmatpush.bf16.msra.mxu2 %v954_v46 }
 0x36b   :  { %958 = vmatpush.bf16.msra.mxu2 %v953_v29 }
 0x36f   :  { %959 = vmatpush.bf16.msra.mxu2 %v952_v9 }
 0x373   :  { %960 = vmatpush.bf16.msra.mxu2 %v951_v54  ;;  %v1724_v54 = vld [vmem:[#allocation2 + $0x130] sm:$0xff] }
 0x374   :  { %1209 = vmatpush.bf16.msra.mxu0 %v1724_v54 }
 0x377   :  { %961 = vmatpush.bf16.msra.mxu2 %v2201_v37  ;;  %v1723_v37 = vld [vmem:[#allocation2 + $0x128] sm:$0xff] }
 0x378   :  { %1210 = vmatpush.bf16.msra.mxu0 %v1723_v37 }
 0x37b   :  { %962 = vmatpush.bf16.msra.mxu2 %v2196_v11  ;;  %v1722_v11 = vld [vmem:[#allocation2 + $0x120] sm:$0xff] }
 0x37c   :  { %1211 = vmatpush.bf16.msra.mxu0 %v1722_v11 }
 0x37f   :  { %963 = vmatpush.bf16.msra.mxu2 %v2191_v2  ;;  %v1721_v2 = vld [vmem:[#allocation2 + $0x118] sm:$0xff] }
 0x380   :  { %1212 = vmatpush.bf16.msra.mxu0 %v1721_v2 }
 0x382   :  { %964 = vmatmul.bf16.vlgmr.msra.gmra.mxu2 %v2002_v18  ;;  %v1720_v18 = vld [vmem:[#allocation2 + $0x110] sm:$0xff] }
 0x384   :  { %1213 = vmatpush.bf16.msra.mxu0 %v1720_v18 }
 0x392   :  { %969 = vmatmul.bf16.gmra.mxu2 %v2038_v26  ;;  %v1719_v26 = vld [vmem:[#allocation2 + $0x108] sm:$0xff] }
 0x393   :  { %1214 = vmatpush.bf16.msra.mxu0 %v1719_v26 }
 0x3a2   :  { %974 = vmatmul.bf16.gmra.mxu2 %v2062_v31 }
 0x3b2   :  { %979 = vmatmul.bf16.gmra.mxu2 %v2007_v19  ;;  %v1718_v19 = vld [vmem:[#allocation2 + $0x100] sm:$0xff] }
 0x3b3   :  { %1215 = vmatpush.bf16.msra.mxu0 %v1718_v19 }
 0x3c2   :  { %984 = vmatmul.bf16.gmra.mxu2 %v2043_v27 }
 0x3d2   :  { %989 = vmatmul.bf16.gmra.mxu2 %v2014_v20 }
 0x3e2   :  { %994 = vmatmul.bf16.gmra.mxu2 %v2048_v28 }
 0x3f2   :  { %999 = vmatmul.bf16.gmra.mxu2 %v2067_v32 }
 0x405   :  { %v965_v20 = vpop.f32.mrf.mxu2 }
 0x406   :  { %v1005_v31 = vmul.f32 %v965_v20, %v2073_v49 }
 0x40d   :  { %v967_v27 = vpop.f32.mrf.mxu2 }
 0x40e   :  { %v1006_v7 = vmul.f32 %v967_v27, %v2075_v51 }
 0x410   :  { %v1021_v12 = vpack.c.bf16 %v1006_v7, %v1005_v31 }
 0x412   :  { %1216 = vmatmul.bf16.vlgmr.msra.gmra.mxu0 %v1021_v12 }
 0x415   :  { %v970_v9 = vpop.f32.mrf.mxu2 }
 0x416   :  { %v1007_v28 = vmul.f32 %v970_v9, %v2080_v56 }
 0x41d   :  { %v972_v15 = vpop.f32.mrf.mxu2 }
 0x41e   :  { %v1008_v16 = vmul.f32 %v972_v15, %v2082_v58 }
 0x420   :  { %v1022_v17 = vpack.c.bf16 %v1008_v16, %v1007_v28 }
 0x422   :  { %1221 = vmatmul.bf16.gmra.mxu0 %v1022_v17 }
 0x425   :  { %v975_v21 = vpop.f32.mrf.mxu2 }
 0x426   :  { %v1009_v32 = vmul.f32 %v975_v21, %v2087_v63 }
 0x42d   :  { %v977_v24 = vpop.f32.mrf.mxu2 }
 0x42e   :  { %v1010_v10 = vmul.f32 %v977_v24, %v2089_v4 }
 0x430   :  { %v1023_v52 = vpack.c.bf16 %v1010_v10, %v1009_v32 }
 0x432   :  { %1226 = vmatmul.bf16.gmra.mxu0 %v1023_v52 }
 0x435   :  { %v980_v49 = vpop.f32.mrf.mxu2 }
 0x436   :  { %v1011_v40 = vmul.f32 %v980_v49, %v2097_v14 }
 0x43d   :  { %v982_v51 = vpop.f32.mrf.mxu2 }
 0x43e   :  { %v1012_v22 = vmul.f32 %v982_v51, %v2094_v13 }
 0x440   :  { %v1024_v25 = vpack.c.bf16 %v1012_v22, %v1011_v40 }
 0x442   :  { %1231 = vmatmul.bf16.gmra.mxu0 %v1024_v25 }
 0x445   :  { %v985_v56 = vpop.f32.mrf.mxu2 }
 0x446   :  { %v1013_v29 = vmul.f32 %v985_v56, %v2103_v8  ;;  %v1120_v8 = vpop.f32.mrf.mxu3 }
 0x44d   :  { %v987_v58 = vpop.f32.mrf.mxu2 }
 0x44e   :  { %v1014_v30 = vmul.f32 %v987_v58, %v2101_v23  ;;  %v1122_v43 = vpop.f32.mrf.mxu3 }
 0x450   :  { %v1025_v5 = vpack.c.bf16 %v1014_v30, %v1013_v29 }
 0x452   :  { %1236 = vmatmul.bf16.gmra.mxu0 %v1025_v5 }
 0x455   :  { %v990_v63 = vpop.f32.mrf.mxu2 }
 0x456   :  { %v1015_v35 = vmul.f32 %v990_v63, %v2110_v34 }
 0x45d   :  { %v992_v4 = vpop.f32.mrf.mxu2 }
 0x45e   :  { %v1016_v36 = vmul.f32 %v992_v4, %v2108_v33  ;;  %v1125_v33 = vpop.f32.mrf.mxu3 }
 0x460   :  { %v1026_v38 = vpack.c.bf16 %v1016_v36, %v1015_v35 }
 0x462   :  { %1241 = vmatmul.bf16.gmra.mxu0 %v1026_v38 }
 0x465   :  { %v995_v14 = vpop.f32.mrf.mxu2 }
 0x466   :  { %v1017_v39 = vmul.f32 %v995_v14, %v2118_v44  ;;  %v1127_v1 = vpop.f32.mrf.mxu3 }
 0x46d   :  { %v997_v13 = vpop.f32.mrf.mxu2 }
 0x46e   :  { %v1018_v3 = vmul.f32 %v997_v13, %v2115_v41  ;;  %v2244_v41 = vld [vmem:[%s2315_s5 + $0x2] ss:$0 sm:$0xff]  ;;  %v1130_v62 = vpop.f32.mrf.mxu3 }
 0x470   :  { %v1027_v42 = vpack.c.bf16 %v1018_v3, %v1017_v39 }
 0x472   :  { %1246 = vmatmul.bf16.gmra.mxu0 %v1027_v42 }
 0x475   :  { %v1000_v23 = vpop.f32.mrf.mxu2 }
 0x476   :  { %v1019_v46 = vmul.f32 %v1000_v23, %v2124_v55  ;;  %v1132_v26 = vpop.f32.mrf.mxu3 }
 0x47d   :  { %v1002_v45 = vpop.f32.mrf.mxu2 }
 0x47e   :  { %v1020_v34 = vmul.f32 %v1002_v45, %v2121_v53  ;;  %v1135_v15 = vpop.f32.mrf.mxu3 }
 0x480   :  { %v1028_v47 = vpack.c.bf16 %v1020_v34, %v1019_v46 }
 0x482   :  { %1251 = vmatmul.bf16.gmra.mxu0 %v1028_v47 }
 0x486   :  { %v1137_v49 = vpop.f32.mrf.mxu3 }
 0x48e   :  { %v1140_v36 = vpop.f32.mrf.mxu3 }
 0x48f   :  { %v1217_v48 = vpop.f32.mrf.mxu0 }
 0x490   :  { %v1218_v57 = vadd.f32 %v1217_v48, %v1120_v8 }
 0x492   :  { %v1262_v44 = vadd.f32 %v2244_v41, %v1218_v57 }
 0x494   :  { %v1278_v60 = vmax.f32 %v1262_v44, 0.0 }
 0x496   :  { %v1294_v53 = vpack.c.bf16 %v1278_v60, %v1278_v60  ;;  %v1142_v8 = vpop.f32.mrf.mxu3 }
 0x497   :  { %v1219_v59 = vpop.f32.mrf.mxu0 }
 0x498   :  { %v1220_v61 = vadd.f32 %v1219_v59, %v1122_v43  ;;  %v2248_v37 = vunpack.c.l.b16 %v1294_v53 }
 0x49a   :  { %v1263_v55 = vadd.f32 %v2244_v41, %v1220_v61 }
 0x49c   :  { %v1279_v0 = vmax.f32 %v1263_v55, 0.0 }
 0x49e   :  { %v1295_v6 = vpack.c.bf16 %v1279_v0, %v1279_v0  ;;  %v1737_v50 = vpack.c.bf16 %v1279_v0, %v1278_v60  ;;  %v1145_v57 = vpop.f32.mrf.mxu3 }
 0x49f   :  { %v1222_v54 = vpop.f32.mrf.mxu0 }
 0x4a0   :  { %1738 = vst [vmem:[#allocation5] sm:$0xff] %v1737_v50   ;;  %v2250_v11 = vunpack.c.l.b16 %v1295_v6  ;;  %v1223_v2 = vadd.f32 %v1222_v54, %v1125_v33 }
 0x4a2   :  { %v1359_v18 = vpack.c.b16 %v2250_v11, %v2248_v37  ;;  %v1264_v19 = vadd.f32 %v2244_v41, %v1223_v2 }
 0x4a4   :  { %v1280_v27 = vmax.f32 %v1264_v19, 0.0 }
 0x4a6   :  { %v1296_v12 = vpack.c.bf16 %v1280_v27, %v1280_v27  ;;  %v1147_v0 = vpop.f32.mrf.mxu3 }
 0x4a7   :  { %v1224_v20 = vpop.f32.mrf.mxu0 }
 0x4a8   :  { %v1225_v31 = vadd.f32 %v1224_v20, %v1127_v1  ;;  %v2256_v21 = vunpack.c.l.b16 %v1296_v12 }
 0x4aa   :  { %v1265_v7 = vadd.f32 %v2244_v41, %v1225_v31 }
 0x4ac   :  { %v1281_v9 = vmax.f32 %v1265_v7, 0.0 }
 0x4ae   :  { %v1297_v28 = vpack.c.bf16 %v1281_v9, %v1281_v9  ;;  %v1742_v16 = vpack.c.bf16 %v1281_v9, %v1280_v27  ;;  %v1150_v19 = vpop.f32.mrf.mxu3 }
 0x4af   :  { %v1227_v17 = vpop.f32.mrf.mxu0 }
 0x4b0   :  { %1774 = vst [vmem:[#allocation5 + $0x8] sm:$0xff] %v1742_v16   ;;  %v2258_v24 = vunpack.c.l.b16 %v1297_v28  ;;  %v1228_v32 = vadd.f32 %v1227_v17, %v1130_v62 }
 0x4b2   :  { %v1360_v10 = vpack.c.b16 %v2258_v24, %v2256_v21  ;;  %v1266_v52 = vadd.f32 %v2244_v41, %v1228_v32 }
 0x4b4   :  { %v1282_v40 = vmax.f32 %v1266_v52, 0.0 }
 0x4b6   :  { %v1298_v56 = vpack.c.bf16 %v1282_v40, %v1282_v40  ;;  %v1152_v9 = vpop.f32.mrf.mxu3 }
 0x4b7   :  { %v1229_v51 = vpop.f32.mrf.mxu0 }
 0x4b8   :  { %v1230_v22 = vadd.f32 %v1229_v51, %v1132_v26  ;;  %v2264_v63 = vunpack.c.l.b16 %v1298_v56 }
 0x4ba   :  { %v1267_v25 = vadd.f32 %v2244_v41, %v1230_v22 }
 0x4bc   :  { %v1283_v58 = vmax.f32 %v1267_v25, 0.0 }
 0x4be   :  { %v1299_v29 = vpack.c.bf16 %v1283_v58, %v1283_v58  ;;  %v1747_v30 = vpack.c.bf16 %v1283_v58, %v1282_v40  ;;  %v1155_v51 = vpop.f32.mrf.mxu3 }
 0x4bf   :  { %v1232_v5 = vpop.f32.mrf.mxu0 }
 0x4c0   :  { %1775 = vst [vmem:[#allocation5 + $0x10] sm:$0xff] %v1747_v30   ;;  %v2266_v4 = vunpack.c.l.b16 %v1299_v29  ;;  %v1233_v35 = vadd.f32 %v1232_v5, %v1135_v15 }
 0x4c2   :  { %v1361_v38 = vpack.c.b16 %v2266_v4, %v2264_v63  ;;  %v1268_v14 = vadd.f32 %v2244_v41, %v1233_v35 }
 0x4c4   :  { %v1284_v39 = vmax.f32 %v1268_v14, 0.0 }
 0x4c6   :  { %v1300_v23 = vpack.c.bf16 %v1284_v39, %v1284_v39  ;;  %v1157_v58 = vpop.f32.mrf.mxu3 }
 0x4c7   :  { %v1234_v13 = vpop.f32.mrf.mxu0 }
 0x4c8   :  { %v1235_v3 = vadd.f32 %v1234_v13, %v1137_v49  ;;  %v2272_v47 = vunpack.c.l.b16 %v1300_v23 }
 0x4ca   :  { %v1269_v42 = vadd.f32 %v2244_v41, %v1235_v3 }
 0x4cc   :  { %v1285_v43 = vmax.f32 %v1269_v42, 0.0 }
 0x4ce   :  { %v1301_v45 = vpack.c.bf16 %v1285_v43, %v1285_v43  ;;  %v1752_v46 = vpack.c.bf16 %v1285_v43, %v1284_v39 }
 0x4cf   :  { %v1237_v34 = vpop.f32.mrf.mxu0 }
 0x4d0   :  { %1776 = vst [vmem:[#allocation5 + $0x18] sm:$0xff] %v1752_v46   ;;  %v2274_v33 = vunpack.c.l.b16 %v1301_v45  ;;  %v1238_v48 = vadd.f32 %v1237_v34, %v1140_v36 }
 0x4d2   :  { %v1362_v1 = vpack.c.b16 %v2274_v33, %v2272_v47  ;;  %v1270_v59 = vadd.f32 %v2244_v41, %v1238_v48 }
 0x4d4   :  { %v1286_v62 = vmax.f32 %v1270_v59, 0.0 }
 0x4d7   :  { %v1239_v44 = vpop.f32.mrf.mxu0 }
 0x4d8   :  { %v1240_v60 = vadd.f32 %v1239_v44, %v1142_v8 }
 0x4da   :  { %v1271_v61 = vadd.f32 %v2244_v41, %v1240_v60  ;;  %v1302_v60 = vpack.c.bf16 %v1286_v62, %v1286_v62 }
 0x4dc   :  { %v1287_v55 = vmax.f32 %v1271_v61, 0.0 }
 0x4de   :  { %v1757_v53 = vpack.c.bf16 %v1287_v55, %v1286_v62  ;;  %v1326_v62 = vld [vmem:[%s2313_s3] sm:$0xf] }
 0x4df   :  { %v1242_v6 = vpop.f32.mrf.mxu0 }
 0x4e0   :  { %1777 = vst [vmem:[#allocation5 + $0x20] sm:$0xff] %v1757_v53   ;;  %v1243_v50 = vadd.f32 %v1242_v6, %v1145_v57  ;;  %v1303_v57 = vpack.c.bf16 %v1287_v55, %v1287_v55 }
 0x4e2   :  { %v1272_v2 = vadd.f32 %v2244_v41, %v1243_v50  ;;  %v1352_v61 = vunpack.c.l.b16 %v1303_v57 }
 0x4e4   :  { %v1288_v27 = vmax.f32 %v1272_v2, 0.0 }
 0x4e6   :  { %v1304_v34 = vpack.c.bf16 %v1288_v27, %v1288_v27 }
 0x4e7   :  { %v1244_v54 = vpop.f32.mrf.mxu0 }
 0x4e8   :  { %v1245_v26 = vadd.f32 %v1244_v54, %v1147_v0  ;;  %v1351_v0 = vunpack.c.l.b16 %v1302_v60 }
 0x4ea   :  { %v1273_v20 = vadd.f32 %v2244_v41, %v1245_v26  ;;  %v1363_v6 = vpack.c.b16 %v1352_v61, %v1351_v0 }
 0x4ec   :  { %v1289_v31 = vmax.f32 %v1273_v20, 0.0 }
 0x4ee   :  { %v1762_v7 = vpack.c.bf16 %v1289_v31, %v1288_v27  ;;  %v1305_v43 = vpack.c.bf16 %v1289_v31, %v1289_v31 }
 0x4ef   :  { %v1247_v12 = vpop.f32.mrf.mxu0 }
 0x4f0   :  { %1778 = vst [vmem:[#allocation5 + $0x28] sm:$0xff] %v1762_v7   ;;  %v1248_v15 = vadd.f32 %v1247_v12, %v1150_v19  ;;  %v1354_v44 = vunpack.c.l.b16 %v1305_v43 }
 0x4f2   :  { %v1274_v16 = vadd.f32 %v2244_v41, %v1248_v15 }
 0x4f4   :  { %v1290_v52 = vmax.f32 %v1274_v16, 0.0 }
 0x4f6   :  { %v1306_v42 = vpack.c.bf16 %v1290_v52, %v1290_v52 }
 0x4f7   :  { %v1249_v28 = vpop.f32.mrf.mxu0 }
 0x4f8   :  { %v1250_v17 = vadd.f32 %v1249_v28, %v1152_v9  ;;  %v1355_v48 = vunpack.c.l.b16 %v1306_v42 }
 0x4fa   :  { %v1275_v32 = vadd.f32 %v2244_v41, %v1250_v17 }
 0x4fc   :  { %v1291_v49 = vmax.f32 %v1275_v32, 0.0 }
 0x4fe   :  { %v1767_v40 = vpack.c.bf16 %v1291_v49, %v1290_v52  ;;  %v1307_v13 = vpack.c.bf16 %v1291_v49, %v1291_v49 }
 0x4ff   :  { %v1252_v22 = vpop.f32.mrf.mxu0 }
 0x500   :  { %1779 = vst [vmem:[#allocation5 + $0x30] sm:$0xff] %v1767_v40   ;;  %v1253_v25 = vadd.f32 %v1252_v22, %v1155_v51  ;;  %v1356_v45 = vunpack.c.l.b16 %v1307_v13 }
 0x502   :  { %v1276_v56 = vadd.f32 %v2244_v41, %v1253_v25  ;;  %v1365_v59 = vpack.c.b16 %v1356_v45, %v1355_v48 }
 0x504   :  { %v1292_v30 = vmax.f32 %v1276_v56, 0.0 }
 0x506   :  { %v1308_v36 = vpack.c.bf16 %v1292_v30, %v1292_v30 }
 0x507   :  { %v1254_v29 = vpop.f32.mrf.mxu0 }
 0x508   :  { %v1255_v5 = vadd.f32 %v1254_v29, %v1157_v58  ;;  %v1357_v8 = vunpack.c.l.b16 %v1308_v36 }
 0x50a   :  { %v1277_v35 = vadd.f32 %v2244_v41, %v1255_v5  ;;  %v1353_v41 = vunpack.c.l.b16 %v1304_v34 }
 0x50c   :  { %v1293_v14 = vmax.f32 %v1277_v35, 0.0  ;;  %v1364_v53 = vpack.c.b16 %v1354_v44, %v1353_v41 }
 0x50e   :  { %v1309_v39 = vpack.c.bf16 %v1293_v14, %v1293_v14  ;;  %v1772_v3 = vpack.c.bf16 %v1293_v14, %v1292_v30 }
 0x510   :  { %1780 = vst [vmem:[#allocation5 + $0x38] sm:$0xff] %v1772_v3   ;;  %v1358_v23 = vunpack.c.l.b16 %v1309_v39 }
 0x511   :  { %1401 = dma.vmem_to_hbm [thread:$0]  %s1394_s4, 1024, %s1396_s12, [#allocation4], %s1861_s29, %s1861_s29, %s1862_s30  }
 0x512   :  { %v1366_v46 = vpack.c.b16 %v1358_v23, %v1357_v8 }
 0x514   :  { %1375 = vmatpush.bf16.msra.mxu1 %v1366_v46 }
 0x518   :  { %1376 = vmatpush.bf16.msra.mxu1 %v1365_v59 }
 0x51c   :  { %1377 = vmatpush.bf16.msra.mxu1 %v1364_v53 }
 0x520   :  { %1378 = vmatpush.bf16.msra.mxu1 %v1363_v6 }
 0x524   :  { %1379 = vmatpush.bf16.msra.mxu1 %v1362_v1 }
 0x528   :  { %1380 = vmatpush.bf16.msra.mxu1 %v1361_v38 }
 0x52c   :  { %1381 = vmatpush.bf16.msra.mxu1 %v1360_v10 }
 0x530   :  { %1382 = vmatpush.bf16.msra.mxu1 %v1359_v18 }
 0x533   :  { %1383 = vmatmul.bf16.vlgmr.msra.gmra.mxu1 %v1326_v62 }
 0x5b0   :  { %v1384_v21 = vpop.f32.mrf.mxu1 }
 0x5b1   :  { %1388 = vst [vmem:[%s2317_s7] sm:$0xff] %v1384_v21 }
 0x5b8   :  { %v1386_v37 = vpop.f32.mrf.mxu1 }
 0x5b9   :  { %1858 = dma.done.wait [#allocation4], 1024  }
 0x5ba   :  { %1859 = vsyncadd [#allocation4], 4294966272 }
 0x5bb   :  { %1410 = vsyncpa [#allocation3], 1 }
 0x5bc   :  { %1411 = vsyncpa [#allocation4], 1 }

</bundles_post_ra>
